<compile_context>
chip_gen: v7x
topology: tpu7x:2x2x1
jax: 0.10.0
libtpu: 0.0.40
codegen_flags: <defaults>
</compile_context>

<pallas_src>
import jax
import jax.numpy as jnp
import numpy as np
from jax.experimental import pallas as pl
from jax.experimental.pallas import tpu as pltpu


# ------------------------------ Pallas kernel ------------------------------ #

def _disc_kernel(x1_ref, w1_ref, b1_ref, s2_ref, w2_ref, b2_ref,
                 s3_ref, w3_ref, b3_ref, w4_ref, b4_ref, o_ref):
    """Entire discriminator for one image; all intermediates live in VMEM."""
    slope = 0.2

    def leaky(y):
        return jnp.maximum(y, slope * y)

    def inorm(y):
        # InstanceNorm2d(affine=False, eps=1e-5), biased variance over HW.
        inv_m = 1.0 / y.shape[0]
        mean = jnp.sum(y, axis=0, keepdims=True) * inv_m
        cent = y - mean
        var = jnp.sum(cent * cent, axis=0, keepdims=True) * inv_m
        return cent * jax.lax.rsqrt(var + 1e-5)

    def conv_s2(x_f32, s_ref, w_ref, b_ref):
        # 4x4 / stride-2 / pad-1 conv as full im2col:
        #   gather the 16 taps with constant 0/1 selection matmuls (exact for
        #   bf16 inputs), then one (M_out, 16*Cin) @ (16*Cin, Cout) MXU matmul.
        xb = x_f32.astype(jnp.bfloat16)
        taps = [jnp.dot(s_ref[t], xb, preferred_element_type=jnp.float32)
                for t in range(16)]
        t_im2col = jnp.concatenate(taps, axis=-1).astype(jnp.bfloat16)
        return jnp.dot(t_im2col, w_ref[...],
                       preferred_element_type=jnp.float32) + b_ref[...]

    # Layer 1: im2col'd in the wrapper -> single matmul + bias + LeakyReLU.
    a1 = jnp.dot(x1_ref[0], w1_ref[...],
                 preferred_element_type=jnp.float32) + b1_ref[...]
    a1 = leaky(a1)                                            # (H/2*W/2, 32) f32

    # Layers 2, 3: conv + InstanceNorm + LeakyReLU (f32 epilogues, never hit HBM).
    a2 = leaky(inorm(conv_s2(a1, s2_ref, w2_ref, b2_ref)))    # (H/4*W/4, 64)
    a3 = leaky(inorm(conv_s2(a2, s3_ref, w3_ref, b3_ref)))    # (4, 128)

    # Layer 4 (4x4, stride 1, pad 1 on a 2x2 map -> 1x1): the receptive field
    # covers the whole input once, so it folds into a weighted full sum against
    # the interior 2x2 slice of its kernel.
    prod = a3 * w4_ref[...]                                   # (4, 128) f32
    red = jnp.sum(prod, axis=1, keepdims=True)                # (4, 1)
    red = jnp.sum(red, axis=0, keepdims=True)                 # (1, 1)
    o_ref[0] = (red + b4_ref[...]).astype(o_ref.dtype)


# --------------------------- Host-side preparation -------------------------- #

def _make_select(h, w):
    """Constant 0/1 gather matrices for a 4x4, stride-2, pad-1 conv.

    Returns (16, OH*OW, H*W): S[t, m, n] = 1 iff output position m reads input
    flat index n for tap t = 4*kh + kw (padding rows/cols simply stay zero).
    """
    oh, ow = h // 2, w // 2
    s = np.zeros((16, oh * ow, h * w), np.float32)
    for kh in range(4):
        for kw in range(4):
            t = 4 * kh + kw
            for ho in range(oh):
                for wo in range(ow):
                    r = 2 * ho + kh - 1
                    c = 2 * wo + kw - 1
                    if 0 <= r < h and 0 <= c < w:
                        s[t, ho * ow + wo, r * w + c] = 1.0
    return s


def _im2col_weight(w):
    """(Cout,Cin,KH,KW) -> (KH*KW*Cin, Cout) bf16, row = (4*kh+kw)*Cin + c."""
    cout, cin, kh, kw = w.shape
    return jnp.transpose(w, (2, 3, 1, 0)).reshape(kh * kw * cin, cout) \
        .astype(jnp.bfloat16)


def prep_discriminator(params, height, width):
    """One-time prep (outside jit): im2col weights, gather matrices, folded L4."""
    assert height % 8 == 0 and width % 8 == 0
    hh1, ww1 = height // 2, width // 2
    hh2, ww2 = hh1 // 2, ww1 // 2
    hh3, ww3 = hh2 // 2, ww2 // 2
    # TODO(synk): generalize the folded final conv to spatial sizes != 16x16.
    assert (hh3, ww3) == (2, 2), "final-conv fold is specialized to 16x16 inputs"

    (w1, b1), (w2, b2), (w3, b3), (w4, b4) = params
    c3 = w4.shape[1]
    # Effective layer-4 weight: out = sum_{i,j,c} x3[i,j,c] * w4[0,c,i+1,j+1] + b4.
    w4e = jnp.transpose(w4[0, :, 1:3, 1:3], (1, 2, 0)).reshape(4, c3) \
        .astype(jnp.float32)

    return dict(
        w1=_im2col_weight(w1), b1=b1.reshape(1, -1).astype(jnp.float32),
        w2=_im2col_weight(w2), b2=b2.reshape(1, -1).astype(jnp.float32),
        w3=_im2col_weight(w3), b3=b3.reshape(1, -1).astype(jnp.float32),
        w4e=w4e, b4=b4.reshape(1, 1).astype(jnp.float32),
        s2=jnp.asarray(_make_select(hh1, ww1), dtype=jnp.bfloat16),
        s3=jnp.asarray(_make_select(hh2, ww2), dtype=jnp.bfloat16),
    )


def _im2col_layer1_xla(x_nhwc):
    """Tiny one-time XLA im2col of the raw input (4x4, stride 2, pad 1)."""
    n, h, w, c = x_nhwc.shape
    oh, ow = h // 2, w // 2
    xp = jnp.pad(x_nhwc, ((0, 0), (1, 1), (1, 1), (0, 0)))
    cols = []
    for kh in range(4):
        for kw in range(4):
            cols.append(xp[:, kh:kh + 2 * oh:2, kw:kw + 2 * ow:2, :]
                        .reshape(n, oh * ow, c))
    return jnp.concatenate(cols, axis=-1)                     # (N, OH*OW, 16*C)


# ------------------------------- Forward pass ------------------------------- #

def discriminator_forward(x_nchw, prepped):
    """Input/output in NCHW to match the PyTorch module."""
    n = x_nchw.shape[0]
    p = prepped
    x_nhwc = jnp.transpose(x_nchw, (0, 2, 3, 1))
    x1 = _im2col_layer1_xla(x_nhwc).astype(jnp.bfloat16)      # (N, 64, 16*Cin)

    out = pl.pallas_call(
        _disc_kernel,
        out_shape=jax.ShapeDtypeStruct((n, 1, 1), jnp.float32),
        grid=(n,),
        in_specs=[
            pl.BlockSpec((1,) + x1.shape[1:], lambda i: (i, 0, 0)),
            pl.BlockSpec(p["w1"].shape, lambda i: (0, 0)),
            pl.BlockSpec(p["b1"].shape, lambda i: (0, 0)),
            pl.BlockSpec(p["s2"].shape, lambda i: (0, 0, 0)),
            pl.BlockSpec(p["w2"].shape, lambda i: (0, 0)),
            pl.BlockSpec(p["b2"].shape, lambda i: (0, 0)),
            pl.BlockSpec(p["s3"].shape, lambda i: (0, 0, 0)),
            pl.BlockSpec(p["w3"].shape, lambda i: (0, 0)),
            pl.BlockSpec(p["b3"].shape, lambda i: (0, 0)),
            pl.BlockSpec(p["w4e"].shape, lambda i: (0, 0)),
            pl.BlockSpec(p["b4"].shape, lambda i: (0, 0)),
        ],
        out_specs=pl.BlockSpec((1, 1, 1), lambda i: (i, 0, 0)),
        compiler_params=pltpu.CompilerParams(
            dimension_semantics=("parallel",)),                # megacore over batch
    )(x1, p["w1"], p["b1"], p["s2"], p["w2"], p["b2"],
      p["s3"], p["w3"], p["b3"], p["w4e"], p["b4"])

    return out.reshape(n, 1, 1, 1)                             # NCHW (N,1,1,1)


# ---------------------------------- Params ---------------------------------- #

def init_discriminator_params(key, in_channel):
    """Deterministic params; shapes/bounds match nn.Conv2d defaults."""
    chans = [(in_channel, 32), (32, 64), (64, 128), (128, 1)]
    params = []
    for cin, cout in chans:
        key, wk, bk = jax.random.split(key, 3)
        bound = 1.0 / np.sqrt(cin * 4 * 4)
        w = jax.random.uniform(wk, (cout, cin, 4, 4), jnp.float32, -bound, bound)
        b = jax.random.uniform(bk, (cout,), jnp.float32, -bound, bound)
        params.append((w, b))
    return params


# --------------------------- Pure-JAX f32 reference ------------------------- #

def _reference_forward(x_nchw, params):
    def conv(x, w, b, stride):
        y = jax.lax.conv_general_dilated(
            x, w, window_strides=(stride, stride), padding=((1, 1), (1, 1)),
            dimension_numbers=("NCHW", "OIHW", "NCHW"),
            precision=jax.lax.Precision.HIGHEST)
        return y + b.reshape(1, -1, 1, 1)

    def inst_lrelu(x):
        mean = jnp.mean(x, axis=(2, 3), keepdims=True)
        var = jnp.mean((x - mean) ** 2, axis=(2, 3), keepdims=True)
        y = (x - mean) * jax.lax.rsqrt(var + 1e-5)
        return jnp.maximum(y, 0.2 * y)

    x = conv(x_nchw, *params[0], 2)
    x = jnp.maximum(x, 0.2 * x)
    x = conv(x, *params[1], 2)
    x = inst_lrelu(x)
    x = conv(x, *params[2], 2)
    x = inst_lrelu(x)
    x = conv(x, *params[3], 1)
    return x


if __name__ == "__main__":
    key = jax.random.PRNGKey(0)
    key, pkey, xkey = jax.random.split(key, 3)

    in_channel = 4
    H = W = 16
    x = jax.random.normal(xkey, (2, in_channel, H, W), dtype=jnp.float32)  # NCHW

    params = init_discriminator_params(pkey, in_channel)
    prepped = prep_discriminator(params, H, W)      # hoisted out of the jit

    fwd = jax.jit(discriminator_forward)
    out = jax.block_until_ready(fwd(x, prepped))

    # 16 -> 8 -> 4 -> 2 -> 1 spatial, single output channel.
    assert out.shape == (2, 1, 1, 1), out.shape
    assert bool(jnp.all(jnp.isfinite(out)))

    ref = _reference_forward(x, params)
    err = float(jnp.max(jnp.abs(out - ref)))
    assert err < 0.15, f"max |err| = {err}"

    print("KERNEL_OK")
</pallas_src>

<mosaic_0001>
module attributes {stable_mosaic.version = 11 : i64} {
  func.func @_disc_kernel(%arg0: i32, %arg1: memref<1x64x64xbf16, #tpu.memory_space<vmem>>, %arg2: memref<64x32xbf16, #tpu.memory_space<vmem>>, %arg3: memref<1x32xf32, #tpu.memory_space<vmem>>, %arg4: memref<16x16x64xbf16, #tpu.memory_space<vmem>>, %arg5: memref<512x64xbf16, #tpu.memory_space<vmem>>, %arg6: memref<1x64xf32, #tpu.memory_space<vmem>>, %arg7: memref<16x4x16xbf16, #tpu.memory_space<vmem>>, %arg8: memref<1024x128xbf16, #tpu.memory_space<vmem>>, %arg9: memref<1x128xf32, #tpu.memory_space<vmem>>, %arg10: memref<4x128xf32, #tpu.memory_space<vmem>>, %arg11: memref<1x1xf32, #tpu.memory_space<vmem>>, %arg12: memref<1x1x1xf32, #tpu.memory_space<vmem>>) attributes {dimension_semantics = [#tpu.dimension_semantics<parallel>], iteration_bounds = array<i64: 2>, scalar_prefetch = 0 : i64, scratch_operands = 0 : i64, tpu.core_type = #tpu.core_type<tc>, window_params = [{transform_indices = @transform_0, window_bounds = array<i64: 1, 64, 64>}, {pipeline_mode = #tpu.pipeline_mode<synchronous>, transform_indices = @transform_1, window_bounds = array<i64: 64, 32>}, {pipeline_mode = #tpu.pipeline_mode<synchronous>, transform_indices = @transform_2, window_bounds = array<i64: 1, 32>}, {pipeline_mode = #tpu.pipeline_mode<synchronous>, transform_indices = @transform_3, window_bounds = array<i64: 16, 16, 64>}, {pipeline_mode = #tpu.pipeline_mode<synchronous>, transform_indices = @transform_4, window_bounds = array<i64: 512, 64>}, {pipeline_mode = #tpu.pipeline_mode<synchronous>, transform_indices = @transform_5, window_bounds = array<i64: 1, 64>}, {pipeline_mode = #tpu.pipeline_mode<synchronous>, transform_indices = @transform_6, window_bounds = array<i64: 16, 4, 16>}, {pipeline_mode = #tpu.pipeline_mode<synchronous>, transform_indices = @transform_7, window_bounds = array<i64: 1024, 128>}, {pipeline_mode = #tpu.pipeline_mode<synchronous>, transform_indices = @transform_8, window_bounds = array<i64: 1, 128>}, {pipeline_mode = #tpu.pipeline_mode<synchronous>, transform_indices = @transform_9, window_bounds = array<i64: 4, 128>}, {pipeline_mode = #tpu.pipeline_mode<synchronous>, transform_indices = @transform_10, window_bounds = array<i64: 1, 1>}, {transform_indices = @transform_11, window_bounds = array<i64: 1, 1, 1>}]} {
    %c0 = arith.constant 0 : index
    %c0_0 = arith.constant 0 : index
    %c0_1 = arith.constant 0 : index
    %0 = vector.load %arg1[%c0, %c0_0, %c0_1] : memref<1x64x64xbf16, #tpu.memory_space<vmem>>, vector<1x64x64xbf16>
    %1 = vector.shape_cast %0 : vector<1x64x64xbf16> to vector<64x64xbf16>
    %c0_2 = arith.constant 0 : index
    %c0_3 = arith.constant 0 : index
    %2 = vector.load %arg2[%c0_2, %c0_3] : memref<64x32xbf16, #tpu.memory_space<vmem>>, vector<64x32xbf16>
    %cst = arith.constant dense<0.000000e+00> : vector<64x32xf32>
    %3 = tpu.matmul %1, %2, %cst {dimension_numbers = #tpu.dot_dimension_numbers<[1], [0], [0], [1], [0, 0, 1, 1], [], []>} : vector<64x64xbf16>, vector<64x32xbf16>, vector<64x32xf32> -> vector<64x32xf32>
    %c0_4 = arith.constant 0 : index
    %c0_5 = arith.constant 0 : index
    %4 = vector.load %arg3[%c0_4, %c0_5] : memref<1x32xf32, #tpu.memory_space<vmem>>, vector<1x32xf32>
    %5 = vector.broadcast %4 : vector<1x32xf32> to vector<64x32xf32>
    %6 = arith.addf %3, %5 : vector<64x32xf32>
    %cst_6 = arith.constant 2.000000e-01 : f32
    %7 = vector.broadcast %cst_6 : f32 to vector<64x32xf32>
    %8 = arith.mulf %7, %6 : vector<64x32xf32>
    %9 = arith.maximumf %6, %8 : vector<64x32xf32>
    %10 = arith.truncf %9 : vector<64x32xf32> to vector<64x32xbf16>
    %c0_7 = arith.constant 0 : index
    %c0_8 = arith.constant 0 : index
    %c0_9 = arith.constant 0 : index
    %11 = vector.load %arg4[%c0_7, %c0_8, %c0_9] : memref<16x16x64xbf16, #tpu.memory_space<vmem>>, vector<1x16x64xbf16>
    %12 = vector.shape_cast %11 : vector<1x16x64xbf16> to vector<16x64xbf16>
    %cst_10 = arith.constant dense<0.000000e+00> : vector<16x32xf32>
    %13 = tpu.matmul %12, %10, %cst_10 {dimension_numbers = #tpu.dot_dimension_numbers<[1], [0], [0], [1], [0, 0, 1, 1], [], []>} : vector<16x64xbf16>, vector<64x32xbf16>, vector<16x32xf32> -> vector<16x32xf32>
    %c1 = arith.constant 1 : index
    %c0_11 = arith.constant 0 : index
    %c0_12 = arith.constant 0 : index
    %14 = vector.load %arg4[%c1, %c0_11, %c0_12] : memref<16x16x64xbf16, #tpu.memory_space<vmem>>, vector<1x16x64xbf16>
    %15 = vector.shape_cast %14 : vector<1x16x64xbf16> to vector<16x64xbf16>
    %cst_13 = arith.constant dense<0.000000e+00> : vector<16x32xf32>
    %16 = tpu.matmul %15, %10, %cst_13 {dimension_numbers = #tpu.dot_dimension_numbers<[1], [0], [0], [1], [0, 0, 1, 1], [], []>} : vector<16x64xbf16>, vector<64x32xbf16>, vector<16x32xf32> -> vector<16x32xf32>
    %c2 = arith.constant 2 : index
    %c0_14 = arith.constant 0 : index
    %c0_15 = arith.constant 0 : index
    %17 = vector.load %arg4[%c2, %c0_14, %c0_15] : memref<16x16x64xbf16, #tpu.memory_space<vmem>>, vector<1x16x64xbf16>
    %18 = vector.shape_cast %17 : vector<1x16x64xbf16> to vector<16x64xbf16>
    %cst_16 = arith.constant dense<0.000000e+00> : vector<16x32xf32>
    %19 = tpu.matmul %18, %10, %cst_16 {dimension_numbers = #tpu.dot_dimension_numbers<[1], [0], [0], [1], [0, 0, 1, 1], [], []>} : vector<16x64xbf16>, vector<64x32xbf16>, vector<16x32xf32> -> vector<16x32xf32>
    %c3 = arith.constant 3 : index
    %c0_17 = arith.constant 0 : index
    %c0_18 = arith.constant 0 : index
    %20 = vector.load %arg4[%c3, %c0_17, %c0_18] : memref<16x16x64xbf16, #tpu.memory_space<vmem>>, vector<1x16x64xbf16>
    %21 = vector.shape_cast %20 : vector<1x16x64xbf16> to vector<16x64xbf16>
    %cst_19 = arith.constant dense<0.000000e+00> : vector<16x32xf32>
    %22 = tpu.matmul %21, %10, %cst_19 {dimension_numbers = #tpu.dot_dimension_numbers<[1], [0], [0], [1], [0, 0, 1, 1], [], []>} : vector<16x64xbf16>, vector<64x32xbf16>, vector<16x32xf32> -> vector<16x32xf32>
    %c4 = arith.constant 4 : index
    %c0_20 = arith.constant 0 : index
    %c0_21 = arith.constant 0 : index
    %23 = vector.load %arg4[%c4, %c0_20, %c0_21] : memref<16x16x64xbf16, #tpu.memory_space<vmem>>, vector<1x16x64xbf16>
    %24 = vector.shape_cast %23 : vector<1x16x64xbf16> to vector<16x64xbf16>
    %cst_22 = arith.constant dense<0.000000e+00> : vector<16x32xf32>
    %25 = tpu.matmul %24, %10, %cst_22 {dimension_numbers = #tpu.dot_dimension_numbers<[1], [0], [0], [1], [0, 0, 1, 1], [], []>} : vector<16x64xbf16>, vector<64x32xbf16>, vector<16x32xf32> -> vector<16x32xf32>
    %c5 = arith.constant 5 : index
    %c0_23 = arith.constant 0 : index
    %c0_24 = arith.constant 0 : index
    %26 = vector.load %arg4[%c5, %c0_23, %c0_24] : memref<16x16x64xbf16, #tpu.memory_space<vmem>>, vector<1x16x64xbf16>
    %27 = vector.shape_cast %26 : vector<1x16x64xbf16> to vector<16x64xbf16>
    %cst_25 = arith.constant dense<0.000000e+00> : vector<16x32xf32>
    %28 = tpu.matmul %27, %10, %cst_25 {dimension_numbers = #tpu.dot_dimension_numbers<[1], [0], [0], [1], [0, 0, 1, 1], [], []>} : vector<16x64xbf16>, vector<64x32xbf16>, vector<16x32xf32> -> vector<16x32xf32>
    %c6 = arith.constant 6 : index
    %c0_26 = arith.constant 0 : index
    %c0_27 = arith.constant 0 : index
    %29 = vector.load %arg4[%c6, %c0_26, %c0_27] : memref<16x16x64xbf16, #tpu.memory_space<vmem>>, vector<1x16x64xbf16>
    %30 = vector.shape_cast %29 : vector<1x16x64xbf16> to vector<16x64xbf16>
    %cst_28 = arith.constant dense<0.000000e+00> : vector<16x32xf32>
    %31 = tpu.matmul %30, %10, %cst_28 {dimension_numbers = #tpu.dot_dimension_numbers<[1], [0], [0], [1], [0, 0, 1, 1], [], []>} : vector<16x64xbf16>, vector<64x32xbf16>, vector<16x32xf32> -> vector<16x32xf32>
    %c7 = arith.constant 7 : index
    %c0_29 = arith.constant 0 : index
    %c0_30 = arith.constant 0 : index
    %32 = vector.load %arg4[%c7, %c0_29, %c0_30] : memref<16x16x64xbf16, #tpu.memory_space<vmem>>, vector<1x16x64xbf16>
    %33 = vector.shape_cast %32 : vector<1x16x64xbf16> to vector<16x64xbf16>
    %cst_31 = arith.constant dense<0.000000e+00> : vector<16x32xf32>
    %34 = tpu.matmul %33, %10, %cst_31 {dimension_numbers = #tpu.dot_dimension_numbers<[1], [0], [0], [1], [0, 0, 1, 1], [], []>} : vector<16x64xbf16>, vector<64x32xbf16>, vector<16x32xf32> -> vector<16x32xf32>
    %c8 = arith.constant 8 : index
    %c0_32 = arith.constant 0 : index
    %c0_33 = arith.constant 0 : index
    %35 = vector.load %arg4[%c8, %c0_32, %c0_33] : memref<16x16x64xbf16, #tpu.memory_space<vmem>>, vector<1x16x64xbf16>
    %36 = vector.shape_cast %35 : vector<1x16x64xbf16> to vector<16x64xbf16>
    %cst_34 = arith.constant dense<0.000000e+00> : vector<16x32xf32>
    %37 = tpu.matmul %36, %10, %cst_34 {dimension_numbers = #tpu.dot_dimension_numbers<[1], [0], [0], [1], [0, 0, 1, 1], [], []>} : vector<16x64xbf16>, vector<64x32xbf16>, vector<16x32xf32> -> vector<16x32xf32>
    %c9 = arith.constant 9 : index
    %c0_35 = arith.constant 0 : index
    %c0_36 = arith.constant 0 : index
    %38 = vector.load %arg4[%c9, %c0_35, %c0_36] : memref<16x16x64xbf16, #tpu.memory_space<vmem>>, vector<1x16x64xbf16>
    %39 = vector.shape_cast %38 : vector<1x16x64xbf16> to vector<16x64xbf16>
    %cst_37 = arith.constant dense<0.000000e+00> : vector<16x32xf32>
    %40 = tpu.matmul %39, %10, %cst_37 {dimension_numbers = #tpu.dot_dimension_numbers<[1], [0], [0], [1], [0, 0, 1, 1], [], []>} : vector<16x64xbf16>, vector<64x32xbf16>, vector<16x32xf32> -> vector<16x32xf32>
    %c10 = arith.constant 10 : index
    %c0_38 = arith.constant 0 : index
    %c0_39 = arith.constant 0 : index
    %41 = vector.load %arg4[%c10, %c0_38, %c0_39] : memref<16x16x64xbf16, #tpu.memory_space<vmem>>, vector<1x16x64xbf16>
    %42 = vector.shape_cast %41 : vector<1x16x64xbf16> to vector<16x64xbf16>
    %cst_40 = arith.constant dense<0.000000e+00> : vector<16x32xf32>
    %43 = tpu.matmul %42, %10, %cst_40 {dimension_numbers = #tpu.dot_dimension_numbers<[1], [0], [0], [1], [0, 0, 1, 1], [], []>} : vector<16x64xbf16>, vector<64x32xbf16>, vector<16x32xf32> -> vector<16x32xf32>
    %c11 = arith.constant 11 : index
    %c0_41 = arith.constant 0 : index
    %c0_42 = arith.constant 0 : index
    %44 = vector.load %arg4[%c11, %c0_41, %c0_42] : memref<16x16x64xbf16, #tpu.memory_space<vmem>>, vector<1x16x64xbf16>
    %45 = vector.shape_cast %44 : vector<1x16x64xbf16> to vector<16x64xbf16>
    %cst_43 = arith.constant dense<0.000000e+00> : vector<16x32xf32>
    %46 = tpu.matmul %45, %10, %cst_43 {dimension_numbers = #tpu.dot_dimension_numbers<[1], [0], [0], [1], [0, 0, 1, 1], [], []>} : vector<16x64xbf16>, vector<64x32xbf16>, vector<16x32xf32> -> vector<16x32xf32>
    %c12 = arith.constant 12 : index
    %c0_44 = arith.constant 0 : index
    %c0_45 = arith.constant 0 : index
    %47 = vector.load %arg4[%c12, %c0_44, %c0_45] : memref<16x16x64xbf16, #tpu.memory_space<vmem>>, vector<1x16x64xbf16>
    %48 = vector.shape_cast %47 : vector<1x16x64xbf16> to vector<16x64xbf16>
    %cst_46 = arith.constant dense<0.000000e+00> : vector<16x32xf32>
    %49 = tpu.matmul %48, %10, %cst_46 {dimension_numbers = #tpu.dot_dimension_numbers<[1], [0], [0], [1], [0, 0, 1, 1], [], []>} : vector<16x64xbf16>, vector<64x32xbf16>, vector<16x32xf32> -> vector<16x32xf32>
    %c13 = arith.constant 13 : index
    %c0_47 = arith.constant 0 : index
    %c0_48 = arith.constant 0 : index
    %50 = vector.load %arg4[%c13, %c0_47, %c0_48] : memref<16x16x64xbf16, #tpu.memory_space<vmem>>, vector<1x16x64xbf16>
    %51 = vector.shape_cast %50 : vector<1x16x64xbf16> to vector<16x64xbf16>
    %cst_49 = arith.constant dense<0.000000e+00> : vector<16x32xf32>
    %52 = tpu.matmul %51, %10, %cst_49 {dimension_numbers = #tpu.dot_dimension_numbers<[1], [0], [0], [1], [0, 0, 1, 1], [], []>} : vector<16x64xbf16>, vector<64x32xbf16>, vector<16x32xf32> -> vector<16x32xf32>
    %c14 = arith.constant 14 : index
    %c0_50 = arith.constant 0 : index
    %c0_51 = arith.constant 0 : index
    %53 = vector.load %arg4[%c14, %c0_50, %c0_51] : memref<16x16x64xbf16, #tpu.memory_space<vmem>>, vector<1x16x64xbf16>
    %54 = vector.shape_cast %53 : vector<1x16x64xbf16> to vector<16x64xbf16>
    %cst_52 = arith.constant dense<0.000000e+00> : vector<16x32xf32>
    %55 = tpu.matmul %54, %10, %cst_52 {dimension_numbers = #tpu.dot_dimension_numbers<[1], [0], [0], [1], [0, 0, 1, 1], [], []>} : vector<16x64xbf16>, vector<64x32xbf16>, vector<16x32xf32> -> vector<16x32xf32>
    %c15 = arith.constant 15 : index
    %c0_53 = arith.constant 0 : index
    %c0_54 = arith.constant 0 : index
    %56 = vector.load %arg4[%c15, %c0_53, %c0_54] : memref<16x16x64xbf16, #tpu.memory_space<vmem>>, vector<1x16x64xbf16>
    %57 = vector.shape_cast %56 : vector<1x16x64xbf16> to vector<16x64xbf16>
    %cst_55 = arith.constant dense<0.000000e+00> : vector<16x32xf32>
    %58 = tpu.matmul %57, %10, %cst_55 {dimension_numbers = #tpu.dot_dimension_numbers<[1], [0], [0], [1], [0, 0, 1, 1], [], []>} : vector<16x64xbf16>, vector<64x32xbf16>, vector<16x32xf32> -> vector<16x32xf32>
    %59 = tpu.concatenate %13, %16, %19, %22, %25, %28, %31, %34, %37, %40, %43, %46, %49, %52, %55, %58 in 1 : vector<16x32xf32>, vector<16x32xf32>, vector<16x32xf32>, vector<16x32xf32>, vector<16x32xf32>, vector<16x32xf32>, vector<16x32xf32>, vector<16x32xf32>, vector<16x32xf32>, vector<16x32xf32>, vector<16x32xf32>, vector<16x32xf32>, vector<16x32xf32>, vector<16x32xf32>, vector<16x32xf32>, vector<16x32xf32> -> vector<16x512xf32>
    %60 = arith.truncf %59 : vector<16x512xf32> to vector<16x512xbf16>
    %c0_56 = arith.constant 0 : index
    %c0_57 = arith.constant 0 : index
    %61 = vector.load %arg5[%c0_56, %c0_57] : memref<512x64xbf16, #tpu.memory_space<vmem>>, vector<512x64xbf16>
    %cst_58 = arith.constant dense<0.000000e+00> : vector<16x64xf32>
    %62 = tpu.matmul %60, %61, %cst_58 {dimension_numbers = #tpu.dot_dimension_numbers<[1], [0], [0], [1], [0, 0, 1, 1], [], []>} : vector<16x512xbf16>, vector<512x64xbf16>, vector<16x64xf32> -> vector<16x64xf32>
    %c0_59 = arith.constant 0 : index
    %c0_60 = arith.constant 0 : index
    %63 = vector.load %arg6[%c0_59, %c0_60] : memref<1x64xf32, #tpu.memory_space<vmem>>, vector<1x64xf32>
    %64 = vector.broadcast %63 : vector<1x64xf32> to vector<16x64xf32>
    %65 = arith.addf %62, %64 : vector<16x64xf32>
    %cst_61 = arith.constant dense<0.000000e+00> : vector<64xf32>
    %66 = vector.multi_reduction <add>, %65, %cst_61 [0] : vector<16x64xf32> to vector<64xf32>
    %67 = vector.shape_cast %66 : vector<64xf32> to vector<1x64xf32>
    %cst_62 = arith.constant 6.250000e-02 : f32
    %68 = vector.broadcast %cst_62 : f32 to vector<1x64xf32>
    %69 = arith.mulf %67, %68 : vector<1x64xf32>
    %70 = vector.broadcast %69 : vector<1x64xf32> to vector<16x64xf32>
    %71 = arith.subf %65, %70 : vector<16x64xf32>
    %72 = arith.mulf %71, %71 : vector<16x64xf32>
    %cst_63 = arith.constant dense<0.000000e+00> : vector<64xf32>
    %73 = vector.multi_reduction <add>, %72, %cst_63 [0] : vector<16x64xf32> to vector<64xf32>
    %74 = vector.shape_cast %73 : vector<64xf32> to vector<1x64xf32>
    %cst_64 = arith.constant 6.250000e-02 : f32
    %75 = vector.broadcast %cst_64 : f32 to vector<1x64xf32>
    %76 = arith.mulf %74, %75 : vector<1x64xf32>
    %cst_65 = arith.constant 9.99999974E-6 : f32
    %77 = vector.broadcast %cst_65 : f32 to vector<1x64xf32>
    %78 = arith.addf %76, %77 : vector<1x64xf32>
    %79 = math.rsqrt %78 : vector<1x64xf32>
    %80 = vector.broadcast %79 : vector<1x64xf32> to vector<16x64xf32>
    %81 = arith.mulf %71, %80 : vector<16x64xf32>
    %cst_66 = arith.constant 2.000000e-01 : f32
    %82 = vector.broadcast %cst_66 : f32 to vector<16x64xf32>
    %83 = arith.mulf %82, %81 : vector<16x64xf32>
    %84 = arith.maximumf %81, %83 : vector<16x64xf32>
    %85 = arith.truncf %84 : vector<16x64xf32> to vector<16x64xbf16>
    %c0_67 = arith.constant 0 : index
    %c0_68 = arith.constant 0 : index
    %c0_69 = arith.constant 0 : index
    %86 = vector.load %arg7[%c0_67, %c0_68, %c0_69] : memref<16x4x16xbf16, #tpu.memory_space<vmem>>, vector<1x4x16xbf16>
    %87 = vector.shape_cast %86 : vector<1x4x16xbf16> to vector<4x16xbf16>
    %cst_70 = arith.constant dense<0.000000e+00> : vector<4x64xf32>
    %88 = tpu.matmul %87, %85, %cst_70 {dimension_numbers = #tpu.dot_dimension_numbers<[1], [0], [0], [1], [0, 0, 1, 1], [], []>} : vector<4x16xbf16>, vector<16x64xbf16>, vector<4x64xf32> -> vector<4x64xf32>
    %c1_71 = arith.constant 1 : index
    %c0_72 = arith.constant 0 : index
    %c0_73 = arith.constant 0 : index
    %89 = vector.load %arg7[%c1_71, %c0_72, %c0_73] : memref<16x4x16xbf16, #tpu.memory_space<vmem>>, vector<1x4x16xbf16>
    %90 = vector.shape_cast %89 : vector<1x4x16xbf16> to vector<4x16xbf16>
    %cst_74 = arith.constant dense<0.000000e+00> : vector<4x64xf32>
    %91 = tpu.matmul %90, %85, %cst_74 {dimension_numbers = #tpu.dot_dimension_numbers<[1], [0], [0], [1], [0, 0, 1, 1], [], []>} : vector<4x16xbf16>, vector<16x64xbf16>, vector<4x64xf32> -> vector<4x64xf32>
    %c2_75 = arith.constant 2 : index
    %c0_76 = arith.constant 0 : index
    %c0_77 = arith.constant 0 : index
    %92 = vector.load %arg7[%c2_75, %c0_76, %c0_77] : memref<16x4x16xbf16, #tpu.memory_space<vmem>>, vector<1x4x16xbf16>
    %93 = vector.shape_cast %92 : vector<1x4x16xbf16> to vector<4x16xbf16>
    %cst_78 = arith.constant dense<0.000000e+00> : vector<4x64xf32>
    %94 = tpu.matmul %93, %85, %cst_78 {dimension_numbers = #tpu.dot_dimension_numbers<[1], [0], [0], [1], [0, 0, 1, 1], [], []>} : vector<4x16xbf16>, vector<16x64xbf16>, vector<4x64xf32> -> vector<4x64xf32>
    %c3_79 = arith.constant 3 : index
    %c0_80 = arith.constant 0 : index
    %c0_81 = arith.constant 0 : index
    %95 = vector.load %arg7[%c3_79, %c0_80, %c0_81] : memref<16x4x16xbf16, #tpu.memory_space<vmem>>, vector<1x4x16xbf16>
    %96 = vector.shape_cast %95 : vector<1x4x16xbf16> to vector<4x16xbf16>
    %cst_82 = arith.constant dense<0.000000e+00> : vector<4x64xf32>
    %97 = tpu.matmul %96, %85, %cst_82 {dimension_numbers = #tpu.dot_dimension_numbers<[1], [0], [0], [1], [0, 0, 1, 1], [], []>} : vector<4x16xbf16>, vector<16x64xbf16>, vector<4x64xf32> -> vector<4x64xf32>
    %c4_83 = arith.constant 4 : index
    %c0_84 = arith.constant 0 : index
    %c0_85 = arith.constant 0 : index
    %98 = vector.load %arg7[%c4_83, %c0_84, %c0_85] : memref<16x4x16xbf16, #tpu.memory_space<vmem>>, vector<1x4x16xbf16>
    %99 = vector.shape_cast %98 : vector<1x4x16xbf16> to vector<4x16xbf16>
    %cst_86 = arith.constant dense<0.000000e+00> : vector<4x64xf32>
    %100 = tpu.matmul %99, %85, %cst_86 {dimension_numbers = #tpu.dot_dimension_numbers<[1], [0], [0], [1], [0, 0, 1, 1], [], []>} : vector<4x16xbf16>, vector<16x64xbf16>, vector<4x64xf32> -> vector<4x64xf32>
    %c5_87 = arith.constant 5 : index
    %c0_88 = arith.constant 0 : index
    %c0_89 = arith.constant 0 : index
    %101 = vector.load %arg7[%c5_87, %c0_88, %c0_89] : memref<16x4x16xbf16, #tpu.memory_space<vmem>>, vector<1x4x16xbf16>
    %102 = vector.shape_cast %101 : vector<1x4x16xbf16> to vector<4x16xbf16>
    %cst_90 = arith.constant dense<0.000000e+00> : vector<4x64xf32>
    %103 = tpu.matmul %102, %85, %cst_90 {dimension_numbers = #tpu.dot_dimension_numbers<[1], [0], [0], [1], [0, 0, 1, 1], [], []>} : vector<4x16xbf16>, vector<16x64xbf16>, vector<4x64xf32> -> vector<4x64xf32>
    %c6_91 = arith.constant 6 : index
    %c0_92 = arith.constant 0 : index
    %c0_93 = arith.constant 0 : index
    %104 = vector.load %arg7[%c6_91, %c0_92, %c0_93] : memref<16x4x16xbf16, #tpu.memory_space<vmem>>, vector<1x4x16xbf16>
    %105 = vector.shape_cast %104 : vector<1x4x16xbf16> to vector<4x16xbf16>
    %cst_94 = arith.constant dense<0.000000e+00> : vector<4x64xf32>
    %106 = tpu.matmul %105, %85, %cst_94 {dimension_numbers = #tpu.dot_dimension_numbers<[1], [0], [0], [1], [0, 0, 1, 1], [], []>} : vector<4x16xbf16>, vector<16x64xbf16>, vector<4x64xf32> -> vector<4x64xf32>
    %c7_95 = arith.constant 7 : index
    %c0_96 = arith.constant 0 : index
    %c0_97 = arith.constant 0 : index
    %107 = vector.load %arg7[%c7_95, %c0_96, %c0_97] : memref<16x4x16xbf16, #tpu.memory_space<vmem>>, vector<1x4x16xbf16>
    %108 = vector.shape_cast %107 : vector<1x4x16xbf16> to vector<4x16xbf16>
    %cst_98 = arith.constant dense<0.000000e+00> : vector<4x64xf32>
    %109 = tpu.matmul %108, %85, %cst_98 {dimension_numbers = #tpu.dot_dimension_numbers<[1], [0], [0], [1], [0, 0, 1, 1], [], []>} : vector<4x16xbf16>, vector<16x64xbf16>, vector<4x64xf32> -> vector<4x64xf32>
    %c8_99 = arith.constant 8 : index
    %c0_100 = arith.constant 0 : index
    %c0_101 = arith.constant 0 : index
    %110 = vector.load %arg7[%c8_99, %c0_100, %c0_101] : memref<16x4x16xbf16, #tpu.memory_space<vmem>>, vector<1x4x16xbf16>
    %111 = vector.shape_cast %110 : vector<1x4x16xbf16> to vector<4x16xbf16>
    %cst_102 = arith.constant dense<0.000000e+00> : vector<4x64xf32>
    %112 = tpu.matmul %111, %85, %cst_102 {dimension_numbers = #tpu.dot_dimension_numbers<[1], [0], [0], [1], [0, 0, 1, 1], [], []>} : vector<4x16xbf16>, vector<16x64xbf16>, vector<4x64xf32> -> vector<4x64xf32>
    %c9_103 = arith.constant 9 : index
    %c0_104 = arith.constant 0 : index
    %c0_105 = arith.constant 0 : index
    %113 = vector.load %arg7[%c9_103, %c0_104, %c0_105] : memref<16x4x16xbf16, #tpu.memory_space<vmem>>, vector<1x4x16xbf16>
    %114 = vector.shape_cast %113 : vector<1x4x16xbf16> to vector<4x16xbf16>
    %cst_106 = arith.constant dense<0.000000e+00> : vector<4x64xf32>
    %115 = tpu.matmul %114, %85, %cst_106 {dimension_numbers = #tpu.dot_dimension_numbers<[1], [0], [0], [1], [0, 0, 1, 1], [], []>} : vector<4x16xbf16>, vector<16x64xbf16>, vector<4x64xf32> -> vector<4x64xf32>
    %c10_107 = arith.constant 10 : index
    %c0_108 = arith.constant 0 : index
    %c0_109 = arith.constant 0 : index
    %116 = vector.load %arg7[%c10_107, %c0_108, %c0_109] : memref<16x4x16xbf16, #tpu.memory_space<vmem>>, vector<1x4x16xbf16>
    %117 = vector.shape_cast %116 : vector<1x4x16xbf16> to vector<4x16xbf16>
    %cst_110 = arith.constant dense<0.000000e+00> : vector<4x64xf32>
    %118 = tpu.matmul %117, %85, %cst_110 {dimension_numbers = #tpu.dot_dimension_numbers<[1], [0], [0], [1], [0, 0, 1, 1], [], []>} : vector<4x16xbf16>, vector<16x64xbf16>, vector<4x64xf32> -> vector<4x64xf32>
    %c11_111 = arith.constant 11 : index
    %c0_112 = arith.constant 0 : index
    %c0_113 = arith.constant 0 : index
    %119 = vector.load %arg7[%c11_111, %c0_112, %c0_113] : memref<16x4x16xbf16, #tpu.memory_space<vmem>>, vector<1x4x16xbf16>
    %120 = vector.shape_cast %119 : vector<1x4x16xbf16> to vector<4x16xbf16>
    %cst_114 = arith.constant dense<0.000000e+00> : vector<4x64xf32>
    %121 = tpu.matmul %120, %85, %cst_114 {dimension_numbers = #tpu.dot_dimension_numbers<[1], [0], [0], [1], [0, 0, 1, 1], [], []>} : vector<4x16xbf16>, vector<16x64xbf16>, vector<4x64xf32> -> vector<4x64xf32>
    %c12_115 = arith.constant 12 : index
    %c0_116 = arith.constant 0 : index
    %c0_117 = arith.constant 0 : index
    %122 = vector.load %arg7[%c12_115, %c0_116, %c0_117] : memref<16x4x16xbf16, #tpu.memory_space<vmem>>, vector<1x4x16xbf16>
    %123 = vector.shape_cast %122 : vector<1x4x16xbf16> to vector<4x16xbf16>
    %cst_118 = arith.constant dense<0.000000e+00> : vector<4x64xf32>
    %124 = tpu.matmul %123, %85, %cst_118 {dimension_numbers = #tpu.dot_dimension_numbers<[1], [0], [0], [1], [0, 0, 1, 1], [], []>} : vector<4x16xbf16>, vector<16x64xbf16>, vector<4x64xf32> -> vector<4x64xf32>
    %c13_119 = arith.constant 13 : index
    %c0_120 = arith.constant 0 : index
    %c0_121 = arith.constant 0 : index
    %125 = vector.load %arg7[%c13_119, %c0_120, %c0_121] : memref<16x4x16xbf16, #tpu.memory_space<vmem>>, vector<1x4x16xbf16>
    %126 = vector.shape_cast %125 : vector<1x4x16xbf16> to vector<4x16xbf16>
    %cst_122 = arith.constant dense<0.000000e+00> : vector<4x64xf32>
    %127 = tpu.matmul %126, %85, %cst_122 {dimension_numbers = #tpu.dot_dimension_numbers<[1], [0], [0], [1], [0, 0, 1, 1], [], []>} : vector<4x16xbf16>, vector<16x64xbf16>, vector<4x64xf32> -> vector<4x64xf32>
    %c14_123 = arith.constant 14 : index
    %c0_124 = arith.constant 0 : index
    %c0_125 = arith.constant 0 : index
    %128 = vector.load %arg7[%c14_123, %c0_124, %c0_125] : memref<16x4x16xbf16, #tpu.memory_space<vmem>>, vector<1x4x16xbf16>
    %129 = vector.shape_cast %128 : vector<1x4x16xbf16> to vector<4x16xbf16>
    %cst_126 = arith.constant dense<0.000000e+00> : vector<4x64xf32>
    %130 = tpu.matmul %129, %85, %cst_126 {dimension_numbers = #tpu.dot_dimension_numbers<[1], [0], [0], [1], [0, 0, 1, 1], [], []>} : vector<4x16xbf16>, vector<16x64xbf16>, vector<4x64xf32> -> vector<4x64xf32>
    %c15_127 = arith.constant 15 : index
    %c0_128 = arith.constant 0 : index
    %c0_129 = arith.constant 0 : index
    %131 = vector.load %arg7[%c15_127, %c0_128, %c0_129] : memref<16x4x16xbf16, #tpu.memory_space<vmem>>, vector<1x4x16xbf16>
    %132 = vector.shape_cast %131 : vector<1x4x16xbf16> to vector<4x16xbf16>
    %cst_130 = arith.constant dense<0.000000e+00> : vector<4x64xf32>
    %133 = tpu.matmul %132, %85, %cst_130 {dimension_numbers = #tpu.dot_dimension_numbers<[1], [0], [0], [1], [0, 0, 1, 1], [], []>} : vector<4x16xbf16>, vector<16x64xbf16>, vector<4x64xf32> -> vector<4x64xf32>
    %134 = tpu.concatenate %88, %91, %94, %97, %100, %103, %106, %109, %112, %115, %118, %121, %124, %127, %130, %133 in 1 : vector<4x64xf32>, vector<4x64xf32>, vector<4x64xf32>, vector<4x64xf32>, vector<4x64xf32>, vector<4x64xf32>, vector<4x64xf32>, vector<4x64xf32>, vector<4x64xf32>, vector<4x64xf32>, vector<4x64xf32>, vector<4x64xf32>, vector<4x64xf32>, vector<4x64xf32>, vector<4x64xf32>, vector<4x64xf32> -> vector<4x1024xf32>
    %135 = arith.truncf %134 : vector<4x1024xf32> to vector<4x1024xbf16>
    %c0_131 = arith.constant 0 : index
    %c0_132 = arith.constant 0 : index
    %136 = vector.load %arg8[%c0_131, %c0_132] : memref<1024x128xbf16, #tpu.memory_space<vmem>>, vector<1024x128xbf16>
    %cst_133 = arith.constant dense<0.000000e+00> : vector<4x128xf32>
    %137 = tpu.matmul %135, %136, %cst_133 {dimension_numbers = #tpu.dot_dimension_numbers<[1], [0], [0], [1], [0, 0, 1, 1], [], []>} : vector<4x1024xbf16>, vector<1024x128xbf16>, vector<4x128xf32> -> vector<4x128xf32>
    %c0_134 = arith.constant 0 : index
    %c0_135 = arith.constant 0 : index
    %138 = vector.load %arg9[%c0_134, %c0_135] : memref<1x128xf32, #tpu.memory_space<vmem>>, vector<1x128xf32>
    %139 = vector.broadcast %138 : vector<1x128xf32> to vector<4x128xf32>
    %140 = arith.addf %137, %139 : vector<4x128xf32>
    %cst_136 = arith.constant dense<0.000000e+00> : vector<128xf32>
    %141 = vector.multi_reduction <add>, %140, %cst_136 [0] : vector<4x128xf32> to vector<128xf32>
    %142 = vector.shape_cast %141 : vector<128xf32> to vector<1x128xf32>
    %cst_137 = arith.constant 2.500000e-01 : f32
    %143 = vector.broadcast %cst_137 : f32 to vector<1x128xf32>
    %144 = arith.mulf %142, %143 : vector<1x128xf32>
    %145 = vector.broadcast %144 : vector<1x128xf32> to vector<4x128xf32>
    %146 = arith.subf %140, %145 : vector<4x128xf32>
    %147 = arith.mulf %146, %146 : vector<4x128xf32>
    %cst_138 = arith.constant dense<0.000000e+00> : vector<128xf32>
    %148 = vector.multi_reduction <add>, %147, %cst_138 [0] : vector<4x128xf32> to vector<128xf32>
    %149 = vector.shape_cast %148 : vector<128xf32> to vector<1x128xf32>
    %cst_139 = arith.constant 2.500000e-01 : f32
    %150 = vector.broadcast %cst_139 : f32 to vector<1x128xf32>
    %151 = arith.mulf %149, %150 : vector<1x128xf32>
    %cst_140 = arith.constant 9.99999974E-6 : f32
    %152 = vector.broadcast %cst_140 : f32 to vector<1x128xf32>
    %153 = arith.addf %151, %152 : vector<1x128xf32>
    %154 = math.rsqrt %153 : vector<1x128xf32>
    %155 = vector.broadcast %154 : vector<1x128xf32> to vector<4x128xf32>
    %156 = arith.mulf %146, %155 : vector<4x128xf32>
    %cst_141 = arith.constant 2.000000e-01 : f32
    %157 = vector.broadcast %cst_141 : f32 to vector<4x128xf32>
    %158 = arith.mulf %157, %156 : vector<4x128xf32>
    %159 = arith.maximumf %156, %158 : vector<4x128xf32>
    %c0_142 = arith.constant 0 : index
    %c0_143 = arith.constant 0 : index
    %160 = vector.load %arg10[%c0_142, %c0_143] : memref<4x128xf32, #tpu.memory_space<vmem>>, vector<4x128xf32>
    %161 = arith.mulf %159, %160 : vector<4x128xf32>
    %cst_144 = arith.constant dense<0.000000e+00> : vector<4xf32>
    %162 = vector.multi_reduction <add>, %161, %cst_144 [1] : vector<4x128xf32> to vector<4xf32>
    %163 = vector.shape_cast %162 : vector<4xf32> to vector<4x1xf32>
    %cst_145 = arith.constant dense<0.000000e+00> : vector<1xf32>
    %164 = vector.multi_reduction <add>, %163, %cst_145 [0] : vector<4x1xf32> to vector<1xf32>
    %165 = vector.shape_cast %164 : vector<1xf32> to vector<1x1xf32>
    %c0_146 = arith.constant 0 : index
    %c0_147 = arith.constant 0 : index
    %166 = vector.load %arg11[%c0_146, %c0_147] : memref<1x1xf32, #tpu.memory_space<vmem>>, vector<1x1xf32>
    %167 = arith.addf %165, %166 : vector<1x1xf32>
    %c0_148 = arith.constant 0 : index
    %c0_149 = arith.constant 0 : index
    %c0_150 = arith.constant 0 : index
    %168 = vector.load %arg12[%c0_148, %c0_149, %c0_150] : memref<1x1x1xf32, #tpu.memory_space<vmem>>, vector<1x1x1xf32>
    %169 = vector.shape_cast %168 : vector<1x1x1xf32> to vector<1x1xf32>
    %170 = vector.shape_cast %167 : vector<1x1xf32> to vector<1x1x1xf32>
    tpu.vector_store %arg12[%c0_148, %c0_149, %c0_150], %170 {strides = array<i32>} : memref<1x1x1xf32, #tpu.memory_space<vmem>>, vector<1x1x1xf32>,
    return
  }
  func.func @transform_0(%arg0: i32) -> (i32, i32, i32) {
    %c0_i32 = arith.constant 0 : i32
    %c0_i32_0 = arith.constant 0 : i32
    %c0_i32_1 = arith.constant 0 : i32
    return %arg0, %c0_i32, %c0_i32_0 : i32, i32, i32
  }
  func.func @transform_1(%arg0: i32) -> (i32, i32) {
    %c0_i32 = arith.constant 0 : i32
    %c0_i32_0 = arith.constant 0 : i32
    %c0_i32_1 = arith.constant 0 : i32
    return %c0_i32, %c0_i32_0 : i32, i32
  }
  func.func @transform_2(%arg0: i32) -> (i32, i32) {
    %c0_i32 = arith.constant 0 : i32
    %c0_i32_0 = arith.constant 0 : i32
    %c0_i32_1 = arith.constant 0 : i32
    return %c0_i32, %c0_i32_0 : i32, i32
  }
  func.func @transform_3(%arg0: i32) -> (i32, i32, i32) {
    %c0_i32 = arith.constant 0 : i32
    %c0_i32_0 = arith.constant 0 : i32
    %c0_i32_1 = arith.constant 0 : i32
    %c0_i32_2 = arith.constant 0 : i32
    return %c0_i32, %c0_i32_0, %c0_i32_1 : i32, i32, i32
  }
  func.func @transform_4(%arg0: i32) -> (i32, i32) {
    %c0_i32 = arith.constant 0 : i32
    %c0_i32_0 = arith.constant 0 : i32
    %c0_i32_1 = arith.constant 0 : i32
    return %c0_i32, %c0_i32_0 : i32, i32
  }
  func.func @transform_5(%arg0: i32) -> (i32, i32) {
    %c0_i32 = arith.constant 0 : i32
    %c0_i32_0 = arith.constant 0 : i32
    %c0_i32_1 = arith.constant 0 : i32
    return %c0_i32, %c0_i32_0 : i32, i32
  }
  func.func @transform_6(%arg0: i32) -> (i32, i32, i32) {
    %c0_i32 = arith.constant 0 : i32
    %c0_i32_0 = arith.constant 0 : i32
    %c0_i32_1 = arith.constant 0 : i32
    %c0_i32_2 = arith.constant 0 : i32
    return %c0_i32, %c0_i32_0, %c0_i32_1 : i32, i32, i32
  }
  func.func @transform_7(%arg0: i32) -> (i32, i32) {
    %c0_i32 = arith.constant 0 : i32
    %c0_i32_0 = arith.constant 0 : i32
    %c0_i32_1 = arith.constant 0 : i32
    return %c0_i32, %c0_i32_0 : i32, i32
  }
  func.func @transform_8(%arg0: i32) -> (i32, i32) {
    %c0_i32 = arith.constant 0 : i32
    %c0_i32_0 = arith.constant 0 : i32
    %c0_i32_1 = arith.constant 0 : i32
    return %c0_i32, %c0_i32_0 : i32, i32
  }
  func.func @transform_9(%arg0: i32) -> (i32, i32) {
    %c0_i32 = arith.constant 0 : i32
    %c0_i32_0 = arith.constant 0 : i32
    %c0_i32_1 = arith.constant 0 : i32
    return %c0_i32, %c0_i32_0 : i32, i32
  }
  func.func @transform_10(%arg0: i32) -> (i32, i32) {
    %c0_i32 = arith.constant 0 : i32
    %c0_i32_0 = arith.constant 0 : i32
    %c0_i32_1 = arith.constant 0 : i32
    return %c0_i32, %c0_i32_0 : i32, i32
  }
  func.func @transform_11(%arg0: i32) -> (i32, i32, i32) {
    %c0_i32 = arith.constant 0 : i32
    %c0_i32_0 = arith.constant 0 : i32
    %c0_i32_1 = arith.constant 0 : i32
    return %arg0, %c0_i32, %c0_i32_0 : i32, i32, i32
  }
}

</mosaic_0001>

<bundles_post_ra>
// kernel: discriminator_forward.1
= control target key start
LH: loop header
LB: loop body
LE: loop exit
PB: predicated region body
PF: predicated region fallthrough
CT: control target
= control target key end

     0   :  { %s4483_s19 = smov 0   ;;  %s5286_s0 = inlined_call_operand.vmem [shape: bf16[2,64,64], index: 0, kind: input, shape index: {}]   ;;  %s5287_s1 = inlined_call_operand.vmem [shape: bf16[64,32], index: 1, kind: input, shape index: {}]   ;;  %s5288_s2 = inlined_call_operand.vmem [shape: f32[1,32], index: 2, kind: input, shape index: {}]   ;;  %s5289_s3 = inlined_call_operand.vmem [shape: bf16[16,16,64], index: 3, kind: input, shape index: {}]   ;;  %s5290_s4 = inlined_call_operand.vmem [shape: bf16[512,64], index: 4, kind: input, shape index: {}]   ;;  %s5291_s5 = inlined_call_operand.vmem [shape: f32[1,64], index: 5, kind: input, shape index: {}]   ;;  %s5292_s6 = inlined_call_operand.vmem [shape: bf16[16,4,16], index: 6, kind: input, shape index: {}]   ;;  %s5293_s7 = inlined_call_operand.vmem [shape: bf16[1024,128], index: 7, kind: input, shape index: {}]   ;;  %s5294_s8 = inlined_call_operand.vmem [shape: f32[1,128], index: 8, kind: input, shape index: {}]   ;;  %s5295_s9 = inlined_call_operand.vmem [shape: f32[4,128], index: 9, kind: input, shape index: {}]   ;;  %s5296_s10 = inlined_call_operand.<no memory space> [shape: f32[1,1], index: 10, kind: input, shape index: {}]   ;;  %s5297_s11 = inlined_call_operand.vmem [shape: f32[2,1,1], index: 11, kind: output, shape index: {}]  }
   0x1   :  { %v16_v0 = vstv %s5296_s10 }
   0x2   :  { %17 = vst [vmem:[#allocation2] sm:$0x1] %v16_v0 }
   0x3 LB: > { %s3420_s20 = sadd.s32 4294967295, %s4413_s19   ;;  %p3424_p0 = scmp.ge.s32.totalorder %s4413_s19, 1  ;;  %s4413_s19 = sphi %s4483_s19, %s23_s19  }
   0x4   : > { %p339_p1 = scmp.lt.s32.totalorder %s4413_s19, 3 }
   0x6   : > { %p340_p2 = pnand %p3424_p0, %p339_p1 }
   0x7   : > { %v4283_v1 = vld [vmem:[%s5287_s1] sm:$0xff] (!%p340_p2)   ;;  %p377_p3 = scmp.lt.s32.totalorder (!%p340_p2), %s3420_s20, 1  ;;  %v4284_v2 = vld [vmem:[%s5287_s1 + $0x8] sm:$0xff] (!%p340_p2)   ;;  %vm453_vm0 = vcmask (!%p340_p2), 523264   ;;  %v4285_v3 = vld [vmem:[%s5287_s1 + $0x10] sm:$0xff] (!%p340_p2)   ;;  %v4415_v9 = vmov (!%p340_p2), 0.0  }
   0x8   : > { %343 = sbr.rel (%p340_p2) target bundleno = 1826 (0x722), region = 64  ;;  %3886 = vmatprep.subr.bf16.mxu0 (!%p340_p2), %v4283_v1  ;;  %v4286_v5 = vld [vmem:[%s5287_s1 + $0x18] sm:$0xff] (!%p340_p2)   ;;  %3902 = vmatprep.subr.bf16.mxu1 (!%p340_p2), %v4415_v9  ;;  %vm4416_vm1 = vmmov (!%p340_p2), 0   ;;  %v3427_v10 = vld [vmem:[%s5288_s2] ss:$0 sm:$0xff] (!%p340_p2)  ;;  %v4292_v48 = vld [vmem:[%s5289_s3 + $0x8] sm:$0xff] (!%p340_p2)  }
   0x9   : > { %3887 = vmatpush3.bf16.msra.mxu0 (!%p340_p2), %v4283_v1  ;;  %3910 = vmatprep.mubr.msk.bf16.mxu1 (!%p340_p2), %vm4416_vm1, %v4415_v9  ;;  %v4291_v47 = vld [vmem:[%s5289_s3] sm:$0xff] (!%p340_p2)   ;;  %v4293_v49 = vld [vmem:[%s5289_s3 + $0x10] sm:$0xff] (!%p340_p2)   ;;  %v4294_v50 = vld [vmem:[%s5289_s3 + $0x18] sm:$0xff] (!%p340_p2)   ;;  %s4417_s30 = smov (!%p340_p2), 32   ;;  %s4418_s22 = smov (!%p340_p2), 64   ;;  %vm1478_vm2 = vcmask (!%p340_p2), 261120  }
   0xa   : > { %3888 = vmatprep.subr.bf16.mxu0 (!%p340_p2), %v4284_v2  ;;  %v4295_v51 = vld [vmem:[%s5289_s3 + $0x20] sm:$0xff] (!%p340_p2)   ;;  %v4296_v52 = vld [vmem:[%s5289_s3 + $0x28] sm:$0xff] (!%p340_p2)   ;;  %v4297_v53 = vld [vmem:[%s5289_s3 + $0x30] sm:$0xff] (!%p340_p2)   ;;  %s4419_s10 = smov (!%p340_p2), 96   ;;  %vm1483_vm3 = vcmask (!%p340_p2), 785408   ;;  %vm1887_vm4 = vcmask (!%p340_p2), 130048  }
   0xb   : > { %v4298_v54 = vld [vmem:[%s5289_s3 + $0x38] sm:$0xff] (!%p340_p2)   ;;  %v4299_v55 = vld [vmem:[%s5289_s3 + $0x40] sm:$0xff] (!%p340_p2)   ;;  %v4300_v56 = vld [vmem:[%s5289_s3 + $0x48] sm:$0xff] (!%p340_p2)   ;;  %vm3333_vm5 = vcmask (!%p340_p2), 1043456   ;;  %vm3371_vm6 = vcmask (!%p340_p2), 0  }
   0xc   : > { %v4301_v57 = vld [vmem:[%s5289_s3 + $0x50] sm:$0xff] (!%p340_p2)   ;;  %v4302_v58 = vld [vmem:[%s5289_s3 + $0x58] sm:$0xff] (!%p340_p2)   ;;  %v4303_v59 = vld [vmem:[%s5289_s3 + $0x60] sm:$0xff] (!%p340_p2)  }
   0xd   : > { %3889 = vmatpush3.bf16.msra.mxu0 (!%p340_p2), %v4284_v2  ;;  %v4304_v60 = vld [vmem:[%s5289_s3 + $0x68] sm:$0xff] (!%p340_p2)   ;;  %v4305_v61 = vld [vmem:[%s5289_s3 + $0x70] sm:$0xff] (!%p340_p2)   ;;  %v4306_v62 = vld [vmem:[%s5289_s3 + $0x78] sm:$0xff] (!%p340_p2)  }
   0xe   : > { %3890 = vmatprep.subr.bf16.mxu0 (!%p340_p2), %v4285_v3 }
   0xf   : > { %s5299_s20 = smov (!%p377_p3, %s3420_s20), 1 }
  0x10   : > { %s3633_s26 = sshll.u32 %s5299_s20, 5  ;;  %s384_s28 = scalar_lea.vmem %s5297_s11, %s5299_s20 }
  0x11   : > { %s381_s29 = scalar_lea.vmem %s5286_s0, %s3633_s26  ;;  %3891 = vmatpush3.bf16.msra.mxu0 %v4285_v3 }
  0x12   : > { %v4287_v4 = vld [vmem:[%s381_s29] sm:$0xff]   ;;  %3892 = vmatprep.subr.bf16.mxu0 %v4286_v5  ;;  %v4288_v6 = vld [vmem:[%s381_s29 + $0x8] sm:$0xff]   ;;  %v4289_v7 = vld [vmem:[%s381_s29 + $0x10] sm:$0xff]  }
  0x13   : > { %3894 = vmatprep.mubr.msk.bf16.mxu0 %vm453_vm0, %v4287_v4  ;;  %v4290_v8 = vld [vmem:[%s381_s29 + $0x18] sm:$0xff]  }
  0x15   : > { %3893 = vmatpush3.bf16.msra.mxu0 %v4286_v5 }
  0x16   : > { %3914 = vmatprep.subr.bf16.mxu0 %v4415_v9 }
  0x18   : > { %3895 = vmatmul.mubr.msk.bf16.vlgmr.msra.gmra.mrb[0].mxu0 %vm453_vm0, %v4288_v6 }
  0x19   : > { %3898 = vmatprep.mubr.msk.bf16.mxu0 %vm453_vm0, %v4289_v7 }
  0x20   : > { %3899 = vmatmul.mubr.msk.bf16.gmra.mrb[4].mxu0 %vm453_vm0, %v4290_v8  ;;  %v4307_v8 = vld [vmem:[%s5290_s4 + $0x40] sm:$0xff]  }
  0x21   : > { %3922 = vmatprep.mubr.msk.bf16.mxu0 %vm4416_vm1, %v4415_v9 }
  0xeb   : > { %v3896_v11 = vpop.f32.mrb[0].mxu0 }
  0xec   : > { %v509_v12 = vadd.f32 %v3896_v11, %v3427_v10  ;;  %v500_v13 = vpop.f32.mrb[1].mxu0  ;;  %v4309_v11 = vld [vmem:[%s5290_s4 + $0x48] sm:$0xff]  }
  0xed   : > { %v501_v14 = vadd.f32 %v3427_v10, %v500_v13  ;;  %v3897_v15 = vpop.f32.mrb[2].mxu0 }
  0xee   : > { %v533_v16 = vmul.f32 0.2, %v509_v12  ;;  %v512_v17 = vadd.f32 %v3897_v15, %v3427_v10  ;;  %v503_v18 = vpop.f32.mrb[3].mxu0 }
  0xef   : > { %v531_v19 = vmul.f32 0.2, %v501_v14  ;;  %v504_v20 = vadd.f32 %v3427_v10, %v503_v18 }
  0xf0   : > { %v534_v21 = vmul.f32 0.2, %v512_v17  ;;  %v541_v23 = vmax.f32 %v509_v12, %v533_v16  ;;  %v4310_v12 = vld [vmem:[%s5290_s4 + $0x8] sm:$0xff]  }
  0xf1   : > { %v532_v22 = vmul.f32 0.2, %v504_v20  ;;  %v539_v25 = vmax.f32 %v501_v14, %v531_v19 }
  0xf2   : > { %v542_v24 = vmax.f32 %v512_v17, %v534_v21 }
  0xf3   : > { %v540_v26 = vmax.f32 %v504_v20, %v532_v22  ;;  %v3900_v27 = vpop.f32.mrb[4].mxu0 }
  0xf4   : > { %v4522_v28 = vpack.c.bf16 %v542_v24, %v541_v23  ;;  %v525_v29 = vadd.f32 %v3900_v27, %v3427_v10  ;;  %v516_v30 = vpop.f32.mrb[5].mxu0  ;;  %v4311_v23 = vld [vmem:[%s5290_s4 + $0x50] sm:$0xff]   ;;  %v4315_v27 = vld [vmem:[%s5290_s4 + $0x60] sm:$0xff]  }
  0xf5   : > { %v4524_v31 = vpack.c.bf16 %v540_v26, %v539_v25  ;;  %v517_v32 = vadd.f32 %v3427_v10, %v516_v30  ;;  %v3901_v33 = vpop.f32.mrb[6].mxu0  ;;  %v4312_v24 = vld [vmem:[%s5290_s4 + $0x10] sm:$0xff]   ;;  %v4313_v25 = vld [vmem:[%s5290_s4 + $0x58] sm:$0xff]  }
  0xf6   : > { %v537_v34 = vmul.f32 0.2, %v525_v29  ;;  %v528_v35 = vadd.f32 %v3901_v33, %v3427_v10  ;;  %v519_v36 = vpop.f32.mrb[7].mxu0  ;;  %v4314_v26 = vld [vmem:[%s5290_s4 + $0x18] sm:$0xff]  }
  0xf7   : > { %v535_v37 = vmul.f32 0.2, %v517_v32  ;;  %v520_v38 = vadd.f32 %v3427_v10, %v519_v36  ;;  %3903 = vmatpush3.bf16.msra.mxu1 %v4524_v31  ;;  %3915 = vmatpush3.bf16.msra.mxu0 %v4524_v31  ;;  %v4308_v10 = vld [vmem:[%s5290_s4] sm:$0xff]  }
  0xf8   : > { %v538_v39 = vmul.f32 0.2, %v528_v35  ;;  %3904 = vmatprep.subr.bf16.mxu1 %v4415_v9  ;;  %3916 = vmatprep.subr.bf16.mxu0 %v4415_v9  ;;  %v545_v41 = vmax.f32 %v525_v29, %v537_v34  ;;  %v4317_v29 = vld [vmem:[%s5290_s4 + $0x68] sm:$0xff]  }
  0xf9   : > { %v536_v40 = vmul.f32 0.2, %v520_v38  ;;  %v543_v43 = vmax.f32 %v517_v32, %v535_v37  ;;  %v4318_v32 = vld [vmem:[%s5290_s4 + $0x28] sm:$0xff]  }
  0xfa   : > { %v546_v42 = vmax.f32 %v528_v35, %v538_v39  ;;  %v4319_v35 = vld [vmem:[%s5290_s4 + $0x70] sm:$0xff]  }
  0xfb   : > { %v544_v44 = vmax.f32 %v520_v38, %v536_v40  ;;  %3905 = vmatpush3.bf16.msra.mxu1 %v4522_v28  ;;  %3917 = vmatpush3.bf16.msra.mxu0 %v4522_v28 }
  0xfc   : > { %v4532_v45 = vpack.c.bf16 %v546_v42, %v545_v41  ;;  %3906 = vmatprep.subr.bf16.mxu1 %v4415_v9  ;;  %3918 = vmatprep.subr.bf16.mxu0 %v4415_v9  ;;  %v4320_v41 = vld [vmem:[%s5290_s4 + $0x30] sm:$0xff]   ;;  %v4321_v42 = vld [vmem:[%s5290_s4 + $0x78] sm:$0xff]  }
  0xfd   : > { %v4536_v46 = vpack.c.bf16 %v544_v44, %v543_v43  ;;  %v4322_v43 = vld [vmem:[%s5290_s4 + $0x38] sm:$0xff]  }
  0xff   : > { %3907 = vmatpush3.bf16.msra.mxu1 %v4536_v46  ;;  %3919 = vmatpush3.bf16.msra.mxu0 %v4536_v46 }
 0x100   : > { %3908 = vmatprep.subr.bf16.mxu1 %v4415_v9  ;;  %3920 = vmatprep.subr.bf16.mxu0 %v4415_v9 }
 0x103   : > { %3909 = vmatpush3.bf16.msra.mxu1 %v4532_v45  ;;  %3921 = vmatpush3.bf16.msra.mxu0 %v4532_v45 }
 0x104   : > { %3926 = vmatprep.subr.bf16.mxu1 %v4415_v9  ;;  %3938 = vmatprep.subr.bf16.mxu0 %v4415_v9 }
 0x106   : > { %3911 = vmatmul.mubr.msk.bf16.vlgmr.msra.gmra.mrb[0].mxu1 %vm453_vm0, %v4291_v47  ;;  %3923 = vmatmul.mubr.msk.bf16.vlgmr.msra.gmra.mrb[8].mxu0 %vm453_vm0, %v4292_v48 }
 0x107   : > { %3927 = vmatpush3.bf16.msra.mxu1 %v4524_v31  ;;  %3939 = vmatpush3.bf16.msra.mxu0 %v4524_v31 }
 0x108   : > { %3928 = vmatprep.subr.bf16.mxu1 %v4415_v9  ;;  %3940 = vmatprep.subr.bf16.mxu0 %v4415_v9 }
 0x109   : > { %3934 = vmatprep.mubr.msk.bf16.mxu1 %vm4416_vm1, %v4415_v9  ;;  %3946 = vmatprep.mubr.msk.bf16.mxu0 %vm4416_vm1, %v4415_v9 }
 0x10b   : > { %3929 = vmatpush3.bf16.msra.mxu1 %v4522_v28  ;;  %3941 = vmatpush3.bf16.msra.mxu0 %v4522_v28 }
 0x10c   : > { %3930 = vmatprep.subr.bf16.mxu1 %v4415_v9  ;;  %3942 = vmatprep.subr.bf16.mxu0 %v4415_v9 }
 0x10f   : > { %3931 = vmatpush3.bf16.msra.mxu1 %v4536_v46  ;;  %3943 = vmatpush3.bf16.msra.mxu0 %v4536_v46 }
 0x110   : > { %3932 = vmatprep.subr.bf16.mxu1 %v4415_v9  ;;  %3944 = vmatprep.subr.bf16.mxu0 %v4415_v9 }
 0x113   : > { %3933 = vmatpush3.bf16.msra.mxu1 %v4532_v45  ;;  %3945 = vmatpush3.bf16.msra.mxu0 %v4532_v45 }
 0x114   : > { %3950 = vmatprep.subr.bf16.mxu1 %v4415_v9  ;;  %3962 = vmatprep.subr.bf16.mxu0 %v4415_v9 }
 0x116   : > { %3935 = vmatmul.mubr.msk.bf16.vlgmr.msra.gmra.mrb[4].mxu1 %vm453_vm0, %v4293_v49  ;;  %3947 = vmatmul.mubr.msk.bf16.vlgmr.msra.gmra.mrb[12].mxu0 %vm453_vm0, %v4294_v50 }
 0x117   : > { %3951 = vmatpush3.bf16.msra.mxu1 %v4524_v31  ;;  %3963 = vmatpush3.bf16.msra.mxu0 %v4524_v31 }
 0x118   : > { %3952 = vmatprep.subr.bf16.mxu1 %v4415_v9  ;;  %3964 = vmatprep.subr.bf16.mxu0 %v4415_v9 }
 0x119   : > { %3958 = vmatprep.mubr.msk.bf16.mxu1 %vm4416_vm1, %v4415_v9  ;;  %3970 = vmatprep.mubr.msk.bf16.mxu0 %vm4416_vm1, %v4415_v9 }
 0x11b   : > { %3953 = vmatpush3.bf16.msra.mxu1 %v4522_v28  ;;  %3965 = vmatpush3.bf16.msra.mxu0 %v4522_v28 }
 0x11c   : > { %3954 = vmatprep.subr.bf16.mxu1 %v4415_v9  ;;  %3966 = vmatprep.subr.bf16.mxu0 %v4415_v9 }
 0x11f   : > { %3955 = vmatpush3.bf16.msra.mxu1 %v4536_v46  ;;  %3967 = vmatpush3.bf16.msra.mxu0 %v4536_v46 }
 0x120   : > { %3956 = vmatprep.subr.bf16.mxu1 %v4415_v9  ;;  %3968 = vmatprep.subr.bf16.mxu0 %v4415_v9 }
 0x123   : > { %3957 = vmatpush3.bf16.msra.mxu1 %v4532_v45  ;;  %3969 = vmatpush3.bf16.msra.mxu0 %v4532_v45 }
 0x124   : > { %3974 = vmatprep.subr.bf16.mxu1 %v4415_v9  ;;  %3986 = vmatprep.subr.bf16.mxu0 %v4415_v9 }
 0x126   : > { %3959 = vmatmul.mubr.msk.bf16.vlgmr.msra.gmra.mrb[8].mxu1 %vm453_vm0, %v4295_v51  ;;  %3971 = vmatmul.mubr.msk.bf16.vlgmr.msra.gmra.mrb[16].mxu0 %vm453_vm0, %v4296_v52 }
 0x127   : > { %3975 = vmatpush3.bf16.msra.mxu1 %v4524_v31  ;;  %3987 = vmatpush3.bf16.msra.mxu0 %v4524_v31 }
 0x128   : > { %3976 = vmatprep.subr.bf16.mxu1 %v4415_v9  ;;  %3988 = vmatprep.subr.bf16.mxu0 %v4415_v9 }
 0x129   : > { %3982 = vmatprep.mubr.msk.bf16.mxu1 %vm4416_vm1, %v4415_v9  ;;  %3994 = vmatprep.mubr.msk.bf16.mxu0 %vm4416_vm1, %v4415_v9 }
 0x12b   : > { %3977 = vmatpush3.bf16.msra.mxu1 %v4522_v28  ;;  %3989 = vmatpush3.bf16.msra.mxu0 %v4522_v28 }
 0x12c   : > { %3978 = vmatprep.subr.bf16.mxu1 %v4415_v9  ;;  %3990 = vmatprep.subr.bf16.mxu0 %v4415_v9 }
 0x12f   : > { %3979 = vmatpush3.bf16.msra.mxu1 %v4536_v46  ;;  %3991 = vmatpush3.bf16.msra.mxu0 %v4536_v46 }
 0x130   : > { %3980 = vmatprep.subr.bf16.mxu1 %v4415_v9  ;;  %3992 = vmatprep.subr.bf16.mxu0 %v4415_v9 }
 0x133   : > { %3981 = vmatpush3.bf16.msra.mxu1 %v4532_v45  ;;  %3993 = vmatpush3.bf16.msra.mxu0 %v4532_v45 }
 0x134   : > { %3998 = vmatprep.subr.bf16.mxu1 %v4415_v9  ;;  %4010 = vmatprep.subr.bf16.mxu0 %v4415_v9 }
 0x136   : > { %3983 = vmatmul.mubr.msk.bf16.vlgmr.msra.gmra.mrb[12].mxu1 %vm453_vm0, %v4297_v53  ;;  %3995 = vmatmul.mubr.msk.bf16.vlgmr.msra.gmra.mrb[20].mxu0 %vm453_vm0, %v4298_v54 }
 0x137   : > { %3999 = vmatpush3.bf16.msra.mxu1 %v4524_v31  ;;  %4011 = vmatpush3.bf16.msra.mxu0 %v4524_v31 }
 0x138   : > { %4000 = vmatprep.subr.bf16.mxu1 %v4415_v9  ;;  %4012 = vmatprep.subr.bf16.mxu0 %v4415_v9 }
 0x139   : > { %4006 = vmatprep.mubr.msk.bf16.mxu1 %vm4416_vm1, %v4415_v9  ;;  %4018 = vmatprep.mubr.msk.bf16.mxu0 %vm4416_vm1, %v4415_v9 }
 0x13b   : > { %4001 = vmatpush3.bf16.msra.mxu1 %v4522_v28  ;;  %4013 = vmatpush3.bf16.msra.mxu0 %v4522_v28 }
 0x13c   : > { %4002 = vmatprep.subr.bf16.mxu1 %v4415_v9  ;;  %4014 = vmatprep.subr.bf16.mxu0 %v4415_v9 }
 0x13f   : > { %4003 = vmatpush3.bf16.msra.mxu1 %v4536_v46  ;;  %4015 = vmatpush3.bf16.msra.mxu0 %v4536_v46 }
 0x140   : > { %4004 = vmatprep.subr.bf16.mxu1 %v4415_v9  ;;  %4016 = vmatprep.subr.bf16.mxu0 %v4415_v9 }
 0x143   : > { %4005 = vmatpush3.bf16.msra.mxu1 %v4532_v45  ;;  %4017 = vmatpush3.bf16.msra.mxu0 %v4532_v45 }
 0x144   : > { %4022 = vmatprep.subr.bf16.mxu1 %v4415_v9  ;;  %4034 = vmatprep.subr.bf16.mxu0 %v4415_v9 }
 0x146   : > { %4007 = vmatmul.mubr.msk.bf16.vlgmr.msra.gmra.mrb[16].mxu1 %vm453_vm0, %v4299_v55  ;;  %4019 = vmatmul.mubr.msk.bf16.vlgmr.msra.gmra.mrb[24].mxu0 %vm453_vm0, %v4300_v56 }
 0x147   : > { %4023 = vmatpush3.bf16.msra.mxu1 %v4524_v31  ;;  %4035 = vmatpush3.bf16.msra.mxu0 %v4524_v31 }
 0x148   : > { %4024 = vmatprep.subr.bf16.mxu1 %v4415_v9  ;;  %4036 = vmatprep.subr.bf16.mxu0 %v4415_v9 }
 0x149   : > { %4030 = vmatprep.mubr.msk.bf16.mxu1 %vm4416_vm1, %v4415_v9  ;;  %4042 = vmatprep.mubr.msk.bf16.mxu0 %vm4416_vm1, %v4415_v9 }
 0x14b   : > { %4025 = vmatpush3.bf16.msra.mxu1 %v4522_v28  ;;  %4037 = vmatpush3.bf16.msra.mxu0 %v4522_v28 }
 0x14c   : > { %4026 = vmatprep.subr.bf16.mxu1 %v4415_v9  ;;  %4038 = vmatprep.subr.bf16.mxu0 %v4415_v9 }
 0x14f   : > { %4027 = vmatpush3.bf16.msra.mxu1 %v4536_v46  ;;  %4039 = vmatpush3.bf16.msra.mxu0 %v4536_v46 }
 0x150   : > { %4028 = vmatprep.subr.bf16.mxu1 %v4415_v9  ;;  %4040 = vmatprep.subr.bf16.mxu0 %v4415_v9 }
 0x153   : > { %4029 = vmatpush3.bf16.msra.mxu1 %v4532_v45  ;;  %4041 = vmatpush3.bf16.msra.mxu0 %v4532_v45 }
 0x154   : > { %4046 = vmatprep.subr.bf16.mxu1 %v4415_v9  ;;  %4058 = vmatprep.subr.bf16.mxu0 %v4415_v9 }
 0x156   : > { %4031 = vmatmul.mubr.msk.bf16.vlgmr.msra.gmra.mrb[20].mxu1 %vm453_vm0, %v4301_v57  ;;  %4043 = vmatmul.mubr.msk.bf16.vlgmr.msra.gmra.mrb[28].mxu0 %vm453_vm0, %v4302_v58 }
 0x157   : > { %4047 = vmatpush3.bf16.msra.mxu1 %v4524_v31  ;;  %4059 = vmatpush3.bf16.msra.mxu0 %v4524_v31 }
 0x158   : > { %4048 = vmatprep.subr.bf16.mxu1 %v4415_v9  ;;  %4060 = vmatprep.subr.bf16.mxu0 %v4415_v9 }
 0x159   : > { %4054 = vmatprep.mubr.msk.bf16.mxu1 %vm4416_vm1, %v4415_v9  ;;  %4066 = vmatprep.mubr.msk.bf16.mxu0 %vm4416_vm1, %v4415_v9 }
 0x15b   : > { %4049 = vmatpush3.bf16.msra.mxu1 %v4522_v28  ;;  %4061 = vmatpush3.bf16.msra.mxu0 %v4522_v28 }
 0x15c   : > { %4050 = vmatprep.subr.bf16.mxu1 %v4415_v9  ;;  %4062 = vmatprep.subr.bf16.mxu0 %v4415_v9 }
 0x15f   : > { %4051 = vmatpush3.bf16.msra.mxu1 %v4536_v46  ;;  %4063 = vmatpush3.bf16.msra.mxu0 %v4536_v46 }
 0x160   : > { %4052 = vmatprep.subr.bf16.mxu1 %v4415_v9  ;;  %4064 = vmatprep.subr.bf16.mxu0 %v4415_v9 }
 0x163   : > { %4053 = vmatpush3.bf16.msra.mxu1 %v4532_v45  ;;  %4065 = vmatpush3.bf16.msra.mxu0 %v4532_v45 }
 0x164   : > { %4070 = vmatprep.subr.bf16.mxu1 %v4415_v9  ;;  %4082 = vmatprep.subr.bf16.mxu0 %v4415_v9 }
 0x166   : > { %4055 = vmatmul.mubr.msk.bf16.vlgmr.msra.gmra.mrb[24].mxu1 %vm453_vm0, %v4303_v59  ;;  %4067 = vmatmul.mubr.msk.bf16.vlgmr.msra.gmra.mrb[32].mxu0 %vm453_vm0, %v4304_v60 }
 0x167   : > { %4071 = vmatpush3.bf16.msra.mxu1 %v4524_v31  ;;  %4083 = vmatpush3.bf16.msra.mxu0 %v4524_v31 }
 0x168   : > { %4072 = vmatprep.subr.bf16.mxu1 %v4415_v9  ;;  %4084 = vmatprep.subr.bf16.mxu0 %v4415_v9 }
 0x169   : > { %4078 = vmatprep.mubr.msk.bf16.mxu1 %vm4416_vm1, %v4415_v9  ;;  %4090 = vmatprep.mubr.msk.bf16.mxu0 %vm4416_vm1, %v4415_v9 }
 0x16b   : > { %4073 = vmatpush3.bf16.msra.mxu1 %v4522_v28  ;;  %4085 = vmatpush3.bf16.msra.mxu0 %v4522_v28  ;;  %v4316_v28 = vld [vmem:[%s5290_s4 + $0x20] sm:$0xff]  }
 0x16c   : > { %4074 = vmatprep.subr.bf16.mxu1 %v4415_v9  ;;  %4086 = vmatprep.subr.bf16.mxu0 %v4415_v9 }
 0x16f   : > { %4075 = vmatpush3.bf16.msra.mxu1 %v4536_v46  ;;  %4087 = vmatpush3.bf16.msra.mxu0 %v4536_v46 }
 0x170   : > { %4076 = vmatprep.subr.bf16.mxu1 %v4415_v9  ;;  %4088 = vmatprep.subr.bf16.mxu0 %v4415_v9 }
 0x173   : > { %4077 = vmatpush3.bf16.msra.mxu1 %v4532_v45  ;;  %4089 = vmatpush3.bf16.msra.mxu0 %v4532_v45 }
 0x174   : > { %3722 = vmatprep.subr.bf16.mxu1 %v4307_v8 }
 0x176   : > { %4079 = vmatmul.mubr.msk.bf16.vlgmr.msra.gmra.mrb[28].mxu1 %vm453_vm0, %v4305_v61  ;;  %4091 = vmatmul.mubr.msk.bf16.vlgmr.msra.gmra.mrb[36].mxu0 %vm453_vm0, %v4306_v62 }
 0x177   : > { %3723 = vmatpush3.bf16.msra.mxu1 %v4308_v10 }
 0x178   : > { %3724 = vmatprep.subr.bf16.mxu1 %v4309_v11 }
 0x17b   : > { %3725 = vmatpush3.bf16.msra.mxu1 %v4310_v12 }
 0x17c   : > { %3726 = vmatprep.subr.bf16.mxu1 %v4311_v23 }
 0x17f   : > { %3727 = vmatpush3.bf16.msra.mxu1 %v4312_v24  ;;  %v4333_v24 = vld [vmem:[%s5290_s4 + $0xe8] sm:$0xff]  }
 0x180   : > { %3728 = vmatprep.subr.bf16.mxu1 %v4313_v25 }
 0x183   : > { %3729 = vmatpush3.bf16.msra.mxu1 %v4314_v26 }
 0x184   : > { %3730 = vmatprep.subr.bf16.mxu1 %v4315_v27 }
 0x187   : > { %3731 = vmatpush3.bf16.msra.mxu1 %v4316_v28 }
 0x188   : > { %3732 = vmatprep.subr.bf16.mxu1 %v4317_v29 }
 0x18b   : > { %3733 = vmatpush3.bf16.msra.mxu1 %v4318_v32 }
 0x18c   : > { %3734 = vmatprep.subr.bf16.mxu1 %v4319_v35  ;;  %v4336_v35 = vld [vmem:[%s5290_s4 + $0xb0] sm:$0xff]  }
 0x18f   : > { %3735 = vmatpush3.bf16.msra.mxu1 %v4320_v41 }
 0x190   : > { %3736 = vmatprep.subr.bf16.mxu1 %v4321_v42 }
 0x193   : > { %3737 = vmatpush3.bf16.msra.mxu1 %v4322_v43 }
 0x194   : > { %4094 = vmatprep.subr.bf16.mxu1 %v4415_v9 }
 0x1d9   : > { %v4748_v63 = vpop.f32.mrb[0].mxu1  ;;  %v647_v0 = vpop.f32.mrb[8].mxu0 }
 0x1da   : > { %v3912_v1 = vpop.f32.mrb[1].mxu1  ;;  %v3924_v2 = vpop.f32.mrb[9].mxu0 }
 0x1db   : > { %v4750_v3 = vpop.f32.mrb[2].mxu1  ;;  %v650_v4 = vpop.f32.mrb[10].mxu0  ;;  %v4324_v1 = vld [vmem:[%s5290_s4 + $0x80] sm:$0xff]   ;;  %v4325_v2 = vld [vmem:[%s5290_s4 + $0xc8] sm:$0xff]  }
 0x1dc   : > { %v4203_v5 = vpack.i.bf16 %v650_v4, %v647_v0  ;;  %v3913_v6 = vpop.f32.mrb[3].mxu1  ;;  %v3925_v7 = vpop.f32.mrb[11].mxu0  ;;  %v4323_v0 = vld [vmem:[%s5290_s4 + $0xc0] sm:$0xff]   ;;  %v4326_v4 = vld [vmem:[%s5290_s4 + $0x88] sm:$0xff]  }
 0x1dd   : > { %3744 = vmatprep.subr.bf16.mxu0 %v4323_v0 }
 0x1de   : > { %4204 = vrot.lane.b32.xlu0 %v4203_v5, %s4417_s30  ;;  %3745 = vmatpush3.bf16.msra.mxu0 %v4324_v1 }
 0x1df   : > { %3746 = vmatprep.subr.bf16.mxu0 %v4325_v2 }
 0x1e2   : > { %3747 = vmatpush3.bf16.msra.mxu0 %v4326_v4 }
 0x1e9   : > { %v699_v13 = vpop.f32.mrb[4].mxu1  ;;  %v751_v14 = vpop.f32.mrb[12].mxu0 }
 0x1ea   : > { %v3936_v15 = vpop.f32.mrb[5].mxu1  ;;  %v3948_v16 = vpop.f32.mrb[13].mxu0 }
 0x1eb   : > { %v702_v17 = vpop.f32.mrb[6].mxu1  ;;  %v754_v18 = vpop.f32.mrb[14].mxu0  ;;  %v4327_v16 = vld [vmem:[%s5290_s4 + $0xd0] sm:$0xff]  }
 0x1ec   : > { %v4208_v19 = vpack.i.bf16 %v702_v17, %v699_v13  ;;  %v3937_v20 = vpop.f32.mrb[7].mxu1  ;;  %v4213_v21 = vpack.i.bf16 %v754_v18, %v751_v14  ;;  %v3949_v22 = vpop.f32.mrb[15].mxu0  ;;  %v4328_v17 = vld [vmem:[%s5290_s4 + $0x90] sm:$0xff]   ;;  %3748 = vmatprep.subr.bf16.mxu0 %v4327_v16  ;;  %v4329_v18 = vld [vmem:[%s5290_s4 + $0xd8] sm:$0xff]  }
 0x1ed   : > { %3749 = vmatpush3.bf16.msra.mxu0 %v4328_v17  ;;  %v4331_v20 = vld [vmem:[%s5290_s4 + $0xe0] sm:$0xff]  }
 0x1ee   : > { %4209 = vrot.lane.b32.xlu1 %v4208_v19, %s4418_s22  ;;  %4214 = vrot.lane.b32.xlu0 %v4213_v21, %s4419_s10  ;;  %v4330_v19 = vld [vmem:[%s5290_s4 + $0x98] sm:$0xff]   ;;  %v4332_v21 = vld [vmem:[%s5290_s4 + $0xa0] sm:$0xff]  }
 0x1ef   : > { %3750 = vmatprep.subr.bf16.mxu0 %v4329_v18 }
 0x1f1   : > { %3751 = vmatpush3.bf16.msra.mxu0 %v4330_v19 }
 0x1f2   : > { %3752 = vmatprep.subr.bf16.mxu0 %v4331_v20 }
 0x1f5   : > { %3753 = vmatpush3.bf16.msra.mxu0 %v4332_v21 }
 0x1f6   : > { %3754 = vmatprep.subr.bf16.mxu0 %v4333_v24 }
 0x1f9   : > { %v4788_v30 = vpop.f32.mrb[8].mxu1  ;;  %v855_v31 = vpop.f32.mrb[16].mxu0 }
 0x1fa   : > { %v3960_v33 = vpop.f32.mrb[9].mxu1  ;;  %v3972_v34 = vpop.f32.mrb[17].mxu0 }
 0x1fb   : > { %v4796_v36 = vpop.f32.mrb[10].mxu1  ;;  %v858_v37 = vpop.f32.mrb[18].mxu0  ;;  %v4334_v33 = vld [vmem:[%s5290_s4 + $0xa8] sm:$0xff]   ;;  %v4335_v34 = vld [vmem:[%s5290_s4 + $0xf0] sm:$0xff]  }
 0x1fc   : > { %v4218_v38 = vpack.i.bf16 %v858_v37, %v855_v31  ;;  %v3961_v39 = vpop.f32.mrb[11].mxu1  ;;  %v3973_v40 = vpop.f32.mrb[19].mxu0  ;;  %3755 = vmatpush3.bf16.msra.mxu0 %v4334_v33  ;;  %v4337_v37 = vld [vmem:[%s5290_s4 + $0xf8] sm:$0xff]  }
 0x1fd   : > { %3756 = vmatprep.subr.bf16.mxu0 %v4335_v34 }
 0x1fe   : > { %4219 = vrot.lane.b32.xlu0 %v4218_v38, %s4417_s30  ;;  %v4338_v38 = vld [vmem:[%s5290_s4 + $0xb8] sm:$0xff]  }
 0x200   : > { %3757 = vmatpush3.bf16.msra.mxu0 %v4336_v35 }
 0x201   : > { %3758 = vmatprep.subr.bf16.mxu0 %v4337_v37 }
 0x204   : > { %3759 = vmatpush3.bf16.msra.mxu0 %v4338_v38 }
 0x205   : > { %4106 = vmatprep.subr.bf16.mxu0 %v4415_v9 }
 0x209   : > { %v907_v44 = vpop.f32.mrb[12].mxu1  ;;  %v959_v45 = vpop.f32.mrb[20].mxu0 }
 0x20a   : > { %v3984_v46 = vpop.f32.mrb[13].mxu1  ;;  %v3996_v47 = vpop.f32.mrb[21].mxu0 }
 0x20b   : > { %v910_v48 = vpop.f32.mrb[14].mxu1  ;;  %v962_v49 = vpop.f32.mrb[22].mxu0 }
 0x20c   : > { %v4223_v50 = vpack.i.bf16 %v910_v48, %v907_v44  ;;  %v3985_v51 = vpop.f32.mrb[15].mxu1  ;;  %v4228_v52 = vpack.i.bf16 %v962_v49, %v959_v45  ;;  %v3997_v53 = vpop.f32.mrb[23].mxu0 }
 0x20e   : > { %4224 = vrot.lane.b32.xlu1 %v4223_v50, %s4418_s22  ;;  %4229 = vrot.lane.b32.xlu0 %v4228_v52, %s4419_s10 }
 0x219   : > { %v4811_v54 = vpop.f32.mrb[16].mxu1  ;;  %v1063_v55 = vpop.f32.mrb[24].mxu0 }
 0x21a   : > { %v4008_v56 = vpop.f32.mrb[17].mxu1  ;;  %v4020_v57 = vpop.f32.mrb[25].mxu0 }
 0x21b   : > { %v4813_v58 = vpop.f32.mrb[18].mxu1  ;;  %v1066_v59 = vpop.f32.mrb[26].mxu0 }
 0x21c   : > { %v4233_v60 = vpack.i.bf16 %v1066_v59, %v1063_v55  ;;  %v4009_v61 = vpop.f32.mrb[19].mxu1  ;;  %v4021_v62 = vpop.f32.mrb[27].mxu0 }
 0x21e   : > { %4234 = vrot.lane.b32.xlu1 %v4233_v60, %s4417_s30 }
 0x229   : > { %v1115_v5 = vpop.f32.mrb[20].mxu1  ;;  %v1167_v6 = vpop.f32.mrb[28].mxu0 }
 0x22a   : > { %v4032_v7 = vpop.f32.mrb[21].mxu1  ;;  %v4044_v8 = vpop.f32.mrb[29].mxu0 }
 0x22b   : > { %v1118_v10 = vpop.f32.mrb[22].mxu1  ;;  %v1170_v11 = vpop.f32.mrb[30].mxu0 }
 0x22c   : > { %v4238_v12 = vpack.i.bf16 %v1118_v10, %v1115_v5  ;;  %v4033_v13 = vpop.f32.mrb[23].mxu1  ;;  %v4258_v14 = vpack.i.bf16 %v1170_v11, %v1167_v6  ;;  %v4045_v15 = vpop.f32.mrb[31].mxu0 }
 0x22e   : > { %4239 = vrot.lane.b32.xlu1 %v4238_v12, %s4418_s22 }
 0x239   : > { %v4847_v22 = vpop.f32.mrb[24].mxu1  ;;  %v1271_v23 = vpop.f32.mrb[32].mxu0 }
 0x23a   : > { %v4056_v25 = vpop.f32.mrb[25].mxu1  ;;  %v4068_v26 = vpop.f32.mrb[33].mxu0 }
 0x23b   : > { %v4852_v27 = vpop.f32.mrb[26].mxu1  ;;  %v1274_v28 = vpop.f32.mrb[34].mxu0 }
 0x23c   : > { %v4243_v29 = vpack.i.bf16 %v1274_v28, %v1271_v23  ;;  %v4057_v31 = vpop.f32.mrb[27].mxu1  ;;  %v4069_v32 = vpop.f32.mrb[35].mxu0 }
 0x23e   : > { %4244 = vrot.lane.b32.xlu1 %v4243_v29, %s4417_s30 }
 0x242   : > { %4259 = vrot.lane.b32.xlu1 %v4258_v14, %s4419_s10 }
 0x249   : > { %v1323_v39 = vpop.f32.mrb[28].mxu1  ;;  %v1375_v40 = vpop.f32.mrb[36].mxu0 }
 0x24a   : > { %v4080_v41 = vpop.f32.mrb[29].mxu1  ;;  %v4092_v42 = vpop.f32.mrb[37].mxu0 }
 0x24b   : > { %v1326_v43 = vpop.f32.mrb[30].mxu1  ;;  %v1378_v44 = vpop.f32.mrb[38].mxu0 }
 0x24c   : > { %v4248_v45 = vpack.i.bf16 %v1326_v43, %v1323_v39  ;;  %v4081_v46 = vpop.f32.mrb[31].mxu1  ;;  %v4253_v47 = vpack.i.bf16 %v1378_v44, %v1375_v40  ;;  %v4093_v48 = vpop.f32.mrb[39].mxu0 }
 0x24e   : > { %4249 = vrot.lane.b32.xlu0 %v4248_v45, %s4418_s22 }
 0x250   : > { %v4205_v49 = vpop.permute.xlu0 %4204 }
 0x251   : > { %v4207_v50 = vunpack.i.h.bf16 %v4205_v49  ;;  %v4206_v51 = vunpack.i.l.bf16 %v4205_v49 }
 0x252   : > { %4254 = vrot.lane.b32.xlu0 %v4253_v47, %s4419_s10 }
 0x253   : > { %v1479_v60 = vsel %vm1478_vm2, %v4748_v63, %v4206_v51  ;;  %v1480_v61 = vsel %vm1478_vm2, %v4750_v3, %v4207_v50 }
 0x260   : > { %v4210_v52 = vpop.permute.xlu1 %4209  ;;  %v4215_v53 = vpop.permute.xlu0 %4214 }
 0x261   : > { %v4212_v55 = vunpack.i.h.bf16 %v4210_v52  ;;  %v4211_v56 = vunpack.i.l.bf16 %v4210_v52  ;;  %v4217_v57 = vunpack.i.h.bf16 %v4215_v53  ;;  %v4216_v59 = vunpack.i.l.bf16 %v4215_v53 }
 0x263   : > { %v1482_v62 = vsel %vm453_vm0, %v1480_v61, %v4212_v55  ;;  %v1481_v0 = vsel %vm453_vm0, %v1479_v60, %v4211_v56 }
 0x264   : > { %v1484_v1 = vsel %vm1483_vm3, %v1481_v0, %v4216_v59  ;;  %v1485_v2 = vsel %vm1483_vm3, %v1482_v62, %v4217_v57  ;;  %v3502_v57 = vld [vmem:[%s5291_s5] ss:$0 sm:$0xff] }
 0x265   : > { %v1504_v4 = vpack.c.bf16 %v1485_v2, %v1484_v1 }
 0x270   : > { %v4220_v5 = vpop.permute.xlu0 %4219 }
 0x271   : > { %v4222_v6 = vunpack.i.h.bf16 %v4220_v5  ;;  %v4221_v7 = vunpack.i.l.bf16 %v4220_v5 }
 0x273   : > { %v1486_v3 = vsel %vm1478_vm2, %v4788_v30, %v4221_v7  ;;  %v1487_v14 = vsel %vm1478_vm2, %v4796_v36, %v4222_v6 }
 0x280   : > { %v4225_v8 = vpop.permute.xlu1 %4224  ;;  %v4230_v10 = vpop.permute.xlu0 %4229 }
 0x281   : > { %v4227_v11 = vunpack.i.h.bf16 %v4225_v8  ;;  %v4226_v12 = vunpack.i.l.bf16 %v4225_v8  ;;  %v4232_v63 = vunpack.i.h.bf16 %v4230_v10  ;;  %v4231_v13 = vunpack.i.l.bf16 %v4230_v10 }
 0x283   : > { %v1489_v15 = vsel %vm453_vm0, %v1487_v14, %v4227_v11  ;;  %v1488_v16 = vsel %vm453_vm0, %v1486_v3, %v4226_v12 }
 0x284   : > { %v1490_v17 = vsel %vm1483_vm3, %v1488_v16, %v4231_v13  ;;  %v1491_v18 = vsel %vm1483_vm3, %v1489_v15, %v4232_v63 }
 0x285   : > { %v1505_v19 = vpack.c.bf16 %v1491_v18, %v1490_v17 }
 0x287   : > { %1803 = vmatprep.mubr.bf16.mxu1 %v1505_v19 }
 0x288   : > { %1804 = vmatmul.mubr.bf16.vlgmr.msra.gmra.mrb[32].mxu1 %v1504_v4 }
 0x289   : > { %4096 = vmatprep.mubr.msk.bf16.mxu1 %vm4416_vm1, %v4415_v9 }
 0x290   : > { %v4235_v20 = vpop.permute.xlu1 %4234 }
 0x291   : > { %v4237_v23 = vunpack.i.h.bf16 %v4235_v20  ;;  %v4236_v24 = vunpack.i.l.bf16 %v4235_v20 }
 0x293   : > { %v1492_v28 = vsel %vm1478_vm2, %v4811_v54, %v4236_v24  ;;  %v1493_v29 = vsel %vm1478_vm2, %v4813_v58, %v4237_v23 }
 0x2a0   : > { %v4240_v21 = vpop.permute.xlu1 %4239 }
 0x2a1   : > { %v4242_v36 = vunpack.i.h.bf16 %v4240_v21  ;;  %v4241_v25 = vunpack.i.l.bf16 %v4240_v21 }
 0x2a3   : > { %v1495_v33 = vsel %vm453_vm0, %v1493_v29, %v4242_v36  ;;  %v1494_v34 = vsel %vm453_vm0, %v1492_v28, %v4241_v25 }
 0x2b0   : > { %v4245_v30 = vpop.permute.xlu1 %4244 }
 0x2b1   : > { %v4247_v40 = vunpack.i.h.bf16 %v4245_v30  ;;  %v4246_v41 = vunpack.i.l.bf16 %v4245_v30 }
 0x2b3   : > { %v1498_v58 = vsel %vm1478_vm2, %v4847_v22, %v4246_v41  ;;  %v1499_v44 = vsel %vm1478_vm2, %v4852_v27, %v4247_v40  ;;  %v1886_v41 = vld [vmem:[%s5292_s6] sm:$0x3] }
 0x2b4   : > { %v4260_v26 = vpop.permute.xlu1 %4259 }
 0x2b5   : > { %v4262_v31 = vunpack.i.h.bf16 %v4260_v26  ;;  %v4261_v32 = vunpack.i.l.bf16 %v4260_v26 }
 0x2b7   : > { %v1496_v35 = vsel %vm1483_vm3, %v1494_v34, %v4261_v32  ;;  %v1497_v37 = vsel %vm1483_vm3, %v1495_v33, %v4262_v31 }
 0x2b8   : > { %v1506_v38 = vpack.c.bf16 %v1497_v37, %v1496_v35 }
 0x2c0   : > { %v4250_v39 = vpop.permute.xlu0 %4249 }
 0x2c1   : > { %v4252_v42 = vunpack.i.h.bf16 %v4250_v39  ;;  %v4251_v43 = vunpack.i.l.bf16 %v4250_v39 }
 0x2c3   : > { %v1501_v47 = vsel %vm453_vm0, %v1499_v44, %v4252_v42  ;;  %v1500_v48 = vsel %vm453_vm0, %v1498_v58, %v4251_v43  ;;  %v3538_v42 = vld [vmem:[%s5292_s6 + $0x4] sm:$0x3]  ;;  %v3536_v43 = vld [vmem:[%s5292_s6 + $0x2] sm:$0x3]  ;;  %v3540_v58 = vld [vmem:[%s5292_s6 + $0x6] sm:$0x3] }
 0x2c4   : > { %v4255_v54 = vpop.permute.xlu0 %4254  ;;  %v3546_v44 = vld [vmem:[%s5292_s6 + $0xc] sm:$0x3] }
 0x2c5   : > { %v4257_v45 = vunpack.i.h.bf16 %v4255_v54  ;;  %v4256_v46 = vunpack.i.l.bf16 %v4255_v54  ;;  %v3542_v54 = vld [vmem:[%s5292_s6 + $0x8] sm:$0x3] }
 0x2c7   : > { %v1502_v49 = vsel %vm1483_vm3, %v1500_v48, %v4256_v46  ;;  %v1503_v50 = vsel %vm1483_vm3, %v1501_v47, %v4257_v45  ;;  %v3544_v45 = vld [vmem:[%s5292_s6 + $0xa] sm:$0x3]  ;;  %v3550_v46 = vld [vmem:[%s5292_s6 + $0x10] sm:$0x3]  ;;  %v3548_v47 = vld [vmem:[%s5292_s6 + $0xe] sm:$0x3] }
 0x2c8   : > { %v1507_v51 = vpack.c.bf16 %v1503_v50, %v1502_v49  ;;  %v3554_v48 = vld [vmem:[%s5292_s6 + $0x14] sm:$0x3]  ;;  %v3552_v49 = vld [vmem:[%s5292_s6 + $0x12] sm:$0x3]  ;;  %v3558_v50 = vld [vmem:[%s5292_s6 + $0x18] sm:$0x3] }
 0x2ca   : > { %1844 = vmatprep.mubr.bf16.mxu0 %v1507_v51  ;;  %v3556_v51 = vld [vmem:[%s5292_s6 + $0x16] sm:$0x3] }
 0x2cb   : > { %1845 = vmatmul.mubr.bf16.vlgmr.msra.gmra.mrb[40].mxu0 %v1506_v38 }
 0x2cc   : > { %4108 = vmatprep.mubr.msk.bf16.mxu0 %vm4416_vm1, %v4415_v9 }
 0x35b   : > { %v3738_v22 = vpop.f32.mrb[32].mxu1 }
 0x35c   : > { %v3739_v52 = vpop.f32.mrb[33].mxu1 }
 0x35d   : > { %v3740_v53 = vadd.f32 %v3739_v52, %v3738_v22  ;;  %v3741_v27 = vpop.f32.mrb[34].mxu1  ;;  %v3562_v22 = vld [vmem:[%s5292_s6 + $0x1c] sm:$0x3]  ;;  %v3560_v52 = vld [vmem:[%s5292_s6 + $0x1a] sm:$0x3] }
 0x35e   : > { %v3742_v55 = vpop.f32.mrb[35].mxu1 }
 0x35f   : > { %v3743_v56 = vadd.f32 %v3742_v55, %v3741_v27  ;;  %v1806_v61 = vadd.f32 %v3740_v53, %v3502_v57  ;;  %v3564_v53 = vld [vmem:[%s5292_s6 + $0x1e] sm:$0x3]  ;;  %v4339_v27 = vld [vmem:[%s5293_s7 + $0x40] sm:$0xff]  }
 0x360   : > { %v4340_v55 = vld [vmem:[%s5293_s7] sm:$0xff]  }
 0x361   : > { %v1809_v2 = vadd.f32 %v3743_v56, %v3502_v57  ;;  %v4341_v56 = vld [vmem:[%s5293_s7 + $0x48] sm:$0xff]   ;;  %v4348_v57 = vld [vmem:[%s5293_s7 + $0xc0] sm:$0xff]  }
 0x39e   : > { %v3760_v59 = vpop.f32.mrb[40].mxu0 }
 0x39f   : > { %v3761_v60 = vpop.f32.mrb[41].mxu0 }
 0x3a0   : > { %v3762_v62 = vadd.f32 %v3761_v60, %v3760_v59  ;;  %v3763_v0 = vpop.f32.mrb[42].mxu0  ;;  %v4350_v59 = vld [vmem:[%s5293_s7 + $0x80] sm:$0xff]   ;;  %v4343_v60 = vld [vmem:[%s5293_s7 + $0x50] sm:$0xff]  }
 0x3a1   : > { %v3764_v1 = vpop.f32.mrb[43].mxu0 }
 0x3a2   : > { %v1847_v4 = vadd.f32 %v3762_v62, %v1806_v61  ;;  %v3765_v5 = vadd.f32 %v3764_v1, %v3763_v0  ;;  %v4352_v61 = vld [vmem:[%s5293_s7 + $0xc8] sm:$0xff]   ;;  %v4344_v0 = vld [vmem:[%s5293_s7 + $0x10] sm:$0xff]  }
 0x3a3   : > { %v4354_v62 = vld [vmem:[%s5293_s7 + $0x88] sm:$0xff]   ;;  %v4356_v1 = vld [vmem:[%s5293_s7 + $0xd0] sm:$0xff]  }
 0x3a4   : > { %v1850_v6 = vadd.f32 %v3765_v5, %v1809_v2  ;;  %v1853_v7 = vsel %vm453_vm0, %v1847_v4, 0.0  ;;  %v4345_v2 = vld [vmem:[%s5293_s7 + $0x58] sm:$0xff]  }
 0x3a5   : > { %v4346_v5 = vld [vmem:[%s5293_s7 + $0x18] sm:$0xff]  }
 0x3a6   : > { %v1854_v8 = vsel %vm453_vm0, %v1850_v6, 0.0 }
 0x3a7   : > { %v1855_v10 = vadd.f32 %v1854_v8, %v1853_v7  ;;  %v4349_v7 = vld [vmem:[%s5293_s7 + $0x20] sm:$0xff]   ;;  %v4351_v8 = vld [vmem:[%s5293_s7 + $0x68] sm:$0xff]  }
 0x3a9   : > { %v1856_v11 = vrot.slane %v1855_v10, 4 }
 0x3ab   : > { %v1857_v12 = vadd.f32 %v1856_v11, %v1855_v10  ;;  %v4353_v10 = vld [vmem:[%s5293_s7 + $0x28] sm:$0xff]   ;;  %v4355_v11 = vld [vmem:[%s5293_s7 + $0x70] sm:$0xff]  }
 0x3ad   : > { %v1858_v63 = vrot.slane %v1857_v12, 2 }
 0x3af   : > { %v1859_v13 = vadd.f32 %v1858_v63, %v1857_v12  ;;  %v4357_v12 = vld [vmem:[%s5293_s7 + $0x30] sm:$0xff]  }
 0x3b1   : > { %v1860_v3 = vrot.slane %v1859_v13, 1 }
 0x3b3   : > { %v1861_v14 = vadd.f32 %v1860_v3, %v1859_v13 }
 0x3b5   : > { %v1862_v15 = vmul.f32 0.0625, %v1861_v14 }
 0x3b7   : > { %v1863_v16 = vsub.f32 %v1847_v4, %v1862_v15  ;;  %v1864_v17 = vsub.f32 %v1850_v6, %v1862_v15  ;;  %v4358_v4 = vld [vmem:[%s5293_s7 + $0x90] sm:$0xff]   ;;  %v4347_v6 = vld [vmem:[%s5293_s7 + $0x60] sm:$0xff]  }
 0x3b9   : > { %v1865_v18 = vmul.f32 %v1863_v16, %v1863_v16  ;;  %v1866_v19 = vmul.f32 %v1864_v17, %v1864_v17 }
 0x3bb   : > { %v1867_v20 = vsel %vm453_vm0, %v1865_v18, 0.0  ;;  %v1868_v21 = vsel %vm453_vm0, %v1866_v19, 0.0  ;;  %v4360_v18 = vld [vmem:[%s5293_s7 + $0xd8] sm:$0xff]  }
 0x3bc   : > { %v1869_v30 = vadd.f32 %v1868_v21, %v1867_v20  ;;  %v4361_v21 = vld [vmem:[%s5293_s7 + $0x38] sm:$0xff]  }
 0x3be   : > { %v1870_v23 = vrot.slane %v1869_v30, 4 }
 0x3c0   : > { %v1871_v24 = vadd.f32 %v1870_v23, %v1869_v30  ;;  %v4362_v30 = vld [vmem:[%s5293_s7 + $0x98] sm:$0xff]  }
 0x3c2   : > { %v1872_v36 = vrot.slane %v1871_v24, 2 }
 0x3c4   : > { %v1873_v25 = vadd.f32 %v1872_v36, %v1871_v24 }
 0x3c6   : > { %v1874_v26 = vrot.slane %v1873_v25, 1 }
 0x3c8   : > { %v1875_v28 = vadd.f32 %v1874_v26, %v1873_v25  ;;  %v4363_v26 = vld [vmem:[%s5293_s7 + $0xe0] sm:$0xff]  }
 0x3ca   : > { %v1876_v29 = vmul.f32 0.0625, %v1875_v28  ;;  %v4364_v28 = vld [vmem:[%s5293_s7 + $0x140] sm:$0xff]  }
 0x3cc   : > { %v1877_v31 = vadd.f32 1e-05, %v1876_v29  ;;  %v4365_v29 = vld [vmem:[%s5293_s7 + $0xa0] sm:$0xff]  }
 0x3ce   : > { %4403 = vrsqrt.f32 %v1877_v31  ;;  %v4367_v31 = vld [vmem:[%s5293_s7 + $0xe8] sm:$0xff]  }
 0x3d8   : > { %v4404_v32 = vpop.eup %4403 }
 0x3d9   : > { %v1879_v33 = vmul.f32 %v4404_v32, %v1863_v16  ;;  %v1880_v34 = vmul.f32 %v4404_v32, %v1864_v17  ;;  %v4359_v17 = vld [vmem:[%s5293_s7 + $0x78] sm:$0xff]  }
 0x3db   : > { %v1881_v35 = vmul.f32 0.2, %v1879_v33  ;;  %v1882_v37 = vmul.f32 0.2, %v1880_v34 }
 0x3dd   : > { %v1883_v38 = vmax.f32 %v1879_v33, %v1881_v35  ;;  %v1884_v39 = vmax.f32 %v1880_v34, %v1882_v37  ;;  %v4369_v33 = vld [vmem:[%s5293_s7 + $0xa8] sm:$0xff]  }
 0x3df   : > { %v4917_v40 = vpack.c.bf16 %v1884_v39, %v1883_v38 }
 0x3e1   : > { %4095 = vmatpush3.bf16.msra.mxu1 %v4917_v40  ;;  %4107 = vmatpush3.bf16.msra.mxu0 %v4917_v40 }
 0x3e2   : > { %4100 = vmatprep.subr.bf16.mxu1 %v4415_v9  ;;  %4118 = vmatprep.subr.bf16.mxu0 %v4415_v9 }
 0x3e4   : > { %4097 = vmatmul.mubr.msk.bf16.vlgmr.msra.gmra.mrb[36].mxu1 %vm1887_vm4, %v1886_v41  ;;  %4109 = vmatmul.mubr.msk.bf16.vlgmr.msra.gmra.mrb[44].mxu0 %vm1887_vm4, %v3538_v42  ;;  %v4371_v41 = vld [vmem:[%s5293_s7 + $0xf0] sm:$0xff]  }
 0x3e5   : > { %4101 = vmatpush3.bf16.msra.mxu1 %v4917_v40  ;;  %4119 = vmatpush3.bf16.msra.mxu0 %v4917_v40 }
 0x3e6   : > { %4102 = vmatprep.mubr.msk.bf16.mxu1 %vm4416_vm1, %v4415_v9  ;;  %4112 = vmatprep.subr.bf16.mxu1 %v4415_v9 }
 0x3e7   : > { %4120 = vmatprep.mubr.msk.bf16.mxu0 %vm4416_vm1, %v4415_v9  ;;  %4130 = vmatprep.subr.bf16.mxu0 %v4415_v9 }
 0x3ec   : > { %4103 = vmatmul.mubr.msk.bf16.vlgmr.msra.gmra.mrb[40].mxu1 %vm1887_vm4, %v3536_v43  ;;  %4121 = vmatmul.mubr.msk.bf16.vlgmr.msra.gmra.mrb[48].mxu0 %vm1887_vm4, %v3542_v54  ;;  %v4373_v43 = vld [vmem:[%s5293_s7 + $0xb0] sm:$0xff]  }
 0x3ed   : > { %4113 = vmatpush3.bf16.msra.mxu1 %v4917_v40  ;;  %4131 = vmatpush3.bf16.msra.mxu0 %v4917_v40 }
 0x3ee   : > { %4114 = vmatprep.mubr.msk.bf16.mxu1 %vm4416_vm1, %v4415_v9  ;;  %4124 = vmatprep.subr.bf16.mxu1 %v4415_v9 }
 0x3ef   : > { %4132 = vmatprep.mubr.msk.bf16.mxu0 %vm4416_vm1, %v4415_v9  ;;  %4142 = vmatprep.subr.bf16.mxu0 %v4415_v9 }
 0x3f4   : > { %4115 = vmatmul.mubr.msk.bf16.vlgmr.msra.gmra.mrb[44].mxu1 %vm1887_vm4, %v3540_v58  ;;  %4133 = vmatmul.mubr.msk.bf16.vlgmr.msra.gmra.mrb[52].mxu0 %vm1887_vm4, %v3546_v44 }
 0x3f5   : > { %4125 = vmatpush3.bf16.msra.mxu1 %v4917_v40  ;;  %4143 = vmatpush3.bf16.msra.mxu0 %v4917_v40 }
 0x3f6   : > { %4126 = vmatprep.mubr.msk.bf16.mxu1 %vm4416_vm1, %v4415_v9  ;;  %4136 = vmatprep.subr.bf16.mxu1 %v4415_v9 }
 0x3f7   : > { %4144 = vmatprep.mubr.msk.bf16.mxu0 %vm4416_vm1, %v4415_v9  ;;  %4154 = vmatprep.subr.bf16.mxu0 %v4415_v9 }
 0x3fc   : > { %4127 = vmatmul.mubr.msk.bf16.vlgmr.msra.gmra.mrb[48].mxu1 %vm1887_vm4, %v3544_v45  ;;  %4145 = vmatmul.mubr.msk.bf16.vlgmr.msra.gmra.mrb[56].mxu0 %vm1887_vm4, %v3550_v46  ;;  %v4375_v45 = vld [vmem:[%s5293_s7 + $0xf8] sm:$0xff]  }
 0x3fd   : > { %4137 = vmatpush3.bf16.msra.mxu1 %v4917_v40  ;;  %4155 = vmatpush3.bf16.msra.mxu0 %v4917_v40 }
 0x3fe   : > { %4138 = vmatprep.mubr.msk.bf16.mxu1 %vm4416_vm1, %v4415_v9  ;;  %4148 = vmatprep.subr.bf16.mxu1 %v4415_v9 }
 0x3ff   : > { %4156 = vmatprep.mubr.msk.bf16.mxu0 %vm4416_vm1, %v4415_v9  ;;  %4166 = vmatprep.subr.bf16.mxu0 %v4415_v9 }
 0x404   : > { %4139 = vmatmul.mubr.msk.bf16.vlgmr.msra.gmra.mrb[52].mxu1 %vm1887_vm4, %v3548_v47  ;;  %4157 = vmatmul.mubr.msk.bf16.vlgmr.msra.gmra.mrb[60].mxu0 %vm1887_vm4, %v3554_v48  ;;  %v4377_v48 = vld [vmem:[%s5293_s7 + $0xb8] sm:$0xff]  }
 0x405   : > { %4149 = vmatpush3.bf16.msra.mxu1 %v4917_v40  ;;  %4167 = vmatpush3.bf16.msra.mxu0 %v4917_v40 }
 0x406   : > { %4150 = vmatprep.mubr.msk.bf16.mxu1 %vm4416_vm1, %v4415_v9  ;;  %4160 = vmatprep.subr.bf16.mxu1 %v4415_v9 }
 0x407   : > { %4168 = vmatprep.mubr.msk.bf16.mxu0 %vm4416_vm1, %v4415_v9  ;;  %4178 = vmatprep.subr.bf16.mxu0 %v4415_v9 }
 0x40c   : > { %4151 = vmatmul.mubr.msk.bf16.vlgmr.msra.gmra.mrb[56].mxu1 %vm1887_vm4, %v3552_v49  ;;  %4169 = vmatmul.mubr.msk.bf16.vlgmr.msra.gmra.mrb[64].mxu0 %vm1887_vm4, %v3558_v50 }
 0x40d   : > { %4161 = vmatpush3.bf16.msra.mxu1 %v4917_v40  ;;  %4179 = vmatpush3.bf16.msra.mxu0 %v4917_v40 }
 0x40e   : > { %4162 = vmatprep.mubr.msk.bf16.mxu1 %vm4416_vm1, %v4415_v9  ;;  %4172 = vmatprep.subr.bf16.mxu1 %v4415_v9 }
 0x40f   : > { %4180 = vmatprep.mubr.msk.bf16.mxu0 %vm4416_vm1, %v4415_v9  ;;  %3798 = vmatprep.subr.bf16.mxu0 %v4339_v27 }
 0x414   : > { %4163 = vmatmul.mubr.msk.bf16.vlgmr.msra.gmra.mrb[60].mxu1 %vm1887_vm4, %v3556_v51  ;;  %4181 = vmatmul.mubr.msk.bf16.vlgmr.msra.gmra.mrb[68].mxu0 %vm1887_vm4, %v3562_v22 }
 0x415   : > { %4173 = vmatpush3.bf16.msra.mxu1 %v4917_v40  ;;  %4174 = vmatprep.mubr.msk.bf16.mxu1 %vm4416_vm1, %v4415_v9 }
 0x416   : > { %4184 = vmatprep.subr.bf16.mxu1 %v4415_v9  ;;  %3799 = vmatpush3.bf16.msra.mxu0 %v4340_v55 }
 0x417   : > { %3800 = vmatprep.subr.bf16.mxu0 %v4341_v56 }
 0x41c   : > { %4175 = vmatmul.mubr.msk.bf16.vlgmr.msra.gmra.mrb[64].mxu1 %vm1887_vm4, %v3560_v52  ;;  %v4380_v52 = vld [vmem:[%s5293_s7 + $0x1c0] sm:$0xff]  }
 0x41d   : > { %4185 = vmatpush3.bf16.msra.mxu1 %v4917_v40  ;;  %4186 = vmatprep.mubr.msk.bf16.mxu1 %vm4416_vm1, %v4415_v9  ;;  %v4342_v9 = vld [vmem:[%s5293_s7 + $0x8] sm:$0xff]  }
 0x41e   : > { %3820 = vmatprep.subr.bf16.mxu1 %v4348_v57  ;;  %3801 = vmatpush3.bf16.msra.mxu0 %v4342_v9 }
 0x41f   : > { %3802 = vmatprep.subr.bf16.mxu0 %v4343_v60 }
 0x422   : > { %3803 = vmatpush3.bf16.msra.mxu0 %v4344_v0 }
 0x423   : > { %3804 = vmatprep.subr.bf16.mxu0 %v4345_v2 }
 0x424   : > { %4187 = vmatmul.mubr.msk.bf16.vlgmr.msra.gmra.mrb[68].mxu1 %vm1887_vm4, %v3564_v53 }
 0x425   : > { %3821 = vmatpush3.bf16.msra.mxu1 %v4350_v59 }
 0x426   : > { %3822 = vmatprep.subr.bf16.mxu1 %v4352_v61  ;;  %3805 = vmatpush3.bf16.msra.mxu0 %v4346_v5 }
 0x427   : > { %3806 = vmatprep.subr.bf16.mxu0 %v4347_v6 }
 0x429   : > { %3823 = vmatpush3.bf16.msra.mxu1 %v4354_v62 }
 0x42a   : > { %3824 = vmatprep.subr.bf16.mxu1 %v4356_v1  ;;  %3807 = vmatpush3.bf16.msra.mxu0 %v4349_v7 }
 0x42b   : > { %3808 = vmatprep.subr.bf16.mxu0 %v4351_v8 }
 0x42d   : > { %3825 = vmatpush3.bf16.msra.mxu1 %v4358_v4 }
 0x42e   : > { %3809 = vmatpush3.bf16.msra.mxu0 %v4353_v10  ;;  %3826 = vmatprep.subr.bf16.mxu1 %v4360_v18 }
 0x42f   : > { %3810 = vmatprep.subr.bf16.mxu0 %v4355_v11 }
 0x431   : > { %3827 = vmatpush3.bf16.msra.mxu1 %v4362_v30 }
 0x432   : > { %3811 = vmatpush3.bf16.msra.mxu0 %v4357_v12  ;;  %3828 = vmatprep.subr.bf16.mxu1 %v4363_v26 }
 0x433   : > { %3812 = vmatprep.subr.bf16.mxu0 %v4359_v17 }
 0x435   : > { %3829 = vmatpush3.bf16.msra.mxu1 %v4365_v29 }
 0x436   : > { %3813 = vmatpush3.bf16.msra.mxu0 %v4361_v21  ;;  %3830 = vmatprep.subr.bf16.mxu1 %v4367_v31 }
 0x437   : > { %3842 = vmatprep.subr.bf16.mxu0 %v4364_v28 }
 0x439   : > { %3831 = vmatpush3.bf16.msra.mxu1 %v4369_v33 }
 0x43a   : > { %3832 = vmatprep.subr.bf16.mxu1 %v4371_v41  ;;  %v4366_v41 = vld [vmem:[%s5293_s7 + $0x100] sm:$0xff]  }
 0x43d   : > { %3833 = vmatpush3.bf16.msra.mxu1 %v4373_v43  ;;  %v4374_v43 = vld [vmem:[%s5293_s7 + $0x110] sm:$0xff]  }
 0x43e   : > { %3834 = vmatprep.subr.bf16.mxu1 %v4375_v45  ;;  %v4378_v45 = vld [vmem:[%s5293_s7 + $0x118] sm:$0xff]  }
 0x441   : > { %3835 = vmatpush3.bf16.msra.mxu1 %v4377_v48  ;;  %v4379_v48 = vld [vmem:[%s5293_s7 + $0x160] sm:$0xff]  }
 0x442   : > { %3864 = vmatprep.subr.bf16.mxu1 %v4380_v52  ;;  %v4381_v52 = vld [vmem:[%s5293_s7 + $0x120] sm:$0xff]  }
 0x4b7   : > { %v5101_v63 = vpop.f32.mrb[36].mxu1  ;;  %v5103_v15 = vpop.f32.mrb[44].mxu0 }
 0x4b8   : > { %v4098_v13 = vpop.f32.mrb[37].mxu1  ;;  %v4110_v16 = vpop.f32.mrb[45].mxu0 }
 0x4b9   : > { %v1928_v3 = vpop.f32.mrb[38].mxu1  ;;  %v2018_v19 = vpop.f32.mrb[46].mxu0 }
 0x4ba   : > { %v4099_v14 = vpop.f32.mrb[39].mxu1  ;;  %v4111_v23 = vpop.f32.mrb[47].mxu0 }
 0x4bf   : > { %v1970_v20 = vpop.f32.mrb[40].mxu1  ;;  %v5129_v32 = vpop.f32.mrb[48].mxu0 }
 0x4c0   : > { %v4104_v24 = vpop.f32.mrb[41].mxu1  ;;  %v4122_v34 = vpop.f32.mrb[49].mxu0 }
 0x4c1   : > { %v1973_v36 = vpop.f32.mrb[42].mxu1  ;;  %v2108_v35 = vpop.f32.mrb[50].mxu0 }
 0x4c2   : > { %v4105_v25 = vpop.f32.mrb[43].mxu1  ;;  %v4123_v38 = vpop.f32.mrb[51].mxu0 }
 0x4c7   : > { %v2060_v37 = vpop.f32.mrb[44].mxu1  ;;  %v5141_v58 = vpop.f32.mrb[52].mxu0 }
 0x4c8   : > { %v4263_v39 = vpack.i.bf16 %v1970_v20, %v2060_v37  ;;  %v4116_v40 = vpop.f32.mrb[45].mxu1  ;;  %v4134_v44 = vpop.f32.mrb[53].mxu0 }
 0x4c9   : > { %v2063_v42 = vpop.f32.mrb[46].mxu1  ;;  %v2198_v46 = vpop.f32.mrb[54].mxu0 }
 0x4ca   : > { %4264 = vrot.lane.b32.xlu0 %v4263_v39, %s4418_s22  ;;  %v4117_v54 = vpop.f32.mrb[47].mxu1  ;;  %v4135_v49 = vpop.f32.mrb[55].mxu0  ;;  %v4368_v42 = vld [vmem:[%s5293_s7 + $0x148] sm:$0xff]  }
 0x4cb   : > { %v4376_v54 = vld [vmem:[%s5293_s7 + $0x158] sm:$0xff]  }
 0x4cf   : > { %v2150_v47 = vpop.f32.mrb[48].mxu1  ;;  %v5152_v53 = vpop.f32.mrb[56].mxu0 }
 0x4d0   : > { %v4128_v50 = vpop.f32.mrb[49].mxu1  ;;  %v4146_v27 = vpop.f32.mrb[57].mxu0 }
 0x4d1   : > { %v2153_v51 = vpop.f32.mrb[50].mxu1  ;;  %v2288_v55 = vpop.f32.mrb[58].mxu0  ;;  %v4382_v27 = vld [vmem:[%s5293_s7 + $0x180] sm:$0xff]  }
 0x4d2   : > { %v4129_v22 = vpop.f32.mrb[51].mxu1  ;;  %v4147_v9 = vpop.f32.mrb[59].mxu0  ;;  %v4383_v55 = vld [vmem:[%s5293_s7 + $0x168] sm:$0xff]  }
 0x4d3   : > { %v4387_v9 = vld [vmem:[%s5293_s7 + $0x170] sm:$0xff]  }
 0x4d7   : > { %v2240_v56 = vpop.f32.mrb[52].mxu1  ;;  %v5155_v62 = vpop.f32.mrb[60].mxu0 }
 0x4d8   : > { %v4268_v57 = vpack.i.bf16 %v2150_v47, %v2240_v56  ;;  %v4140_v59 = vpop.f32.mrb[53].mxu1  ;;  %v4158_v0 = vpop.f32.mrb[61].mxu0  ;;  %v4386_v56 = vld [vmem:[%s5293_s7 + $0x188] sm:$0xff]  }
 0x4d9   : > { %v2243_v60 = vpop.f32.mrb[54].mxu1  ;;  %v2378_v1 = vpop.f32.mrb[62].mxu0  ;;  %v4389_v59 = vld [vmem:[%s5293_s7 + $0x130] sm:$0xff]   ;;  %v4392_v0 = vld [vmem:[%s5293_s7 + $0x1d8] sm:$0xff]  }
 0x4da   : > { %4269 = vrot.lane.b32.xlu1 %v4268_v57, %s4418_s22  ;;  %v4141_v61 = vpop.f32.mrb[55].mxu1  ;;  %v4159_v4 = vpop.f32.mrb[63].mxu0  ;;  %v4388_v57 = vld [vmem:[%s5293_s7 + $0x1d0] sm:$0xff]  }
 0x4db   : > { %v4390_v60 = vld [vmem:[%s5293_s7 + $0x190] sm:$0xff]   ;;  %v4391_v61 = vld [vmem:[%s5293_s7 + $0x178] sm:$0xff]  }
 0x4dc   : > { %v4394_v4 = vld [vmem:[%s5293_s7 + $0x198] sm:$0xff]  }
 0x4df   : > { %v2330_v2 = vpop.f32.mrb[56].mxu1  ;;  %v5157_v8 = vpop.f32.mrb[64].mxu0 }
 0x4e0   : > { %v4152_v5 = vpop.f32.mrb[57].mxu1  ;;  %v4170_v10 = vpop.f32.mrb[65].mxu0 }
 0x4e1   : > { %v2333_v6 = vpop.f32.mrb[58].mxu1  ;;  %v2468_v11 = vpop.f32.mrb[66].mxu0 }
 0x4e2   : > { %v4153_v7 = vpop.f32.mrb[59].mxu1  ;;  %v4171_v13 = vpop.f32.mrb[67].mxu0 }
 0x4e3   : > { %v4395_v7 = vld [vmem:[%s5293_s7 + $0x1e0] sm:$0xff]  }
 0x4e7   : > { %v2420_v12 = vpop.f32.mrb[60].mxu1  ;;  %v5160_v18 = vpop.f32.mrb[68].mxu0 }
 0x4e8   : > { %v4273_v3 = vpack.i.bf16 %v2330_v2, %v2420_v12  ;;  %v4164_v14 = vpop.f32.mrb[61].mxu1  ;;  %v4182_v19 = vpop.f32.mrb[69].mxu0  ;;  %v4393_v2 = vld [vmem:[%s5293_s7 + $0x138] sm:$0xff]  }
 0x4e9   : > { %v2423_v16 = vpop.f32.mrb[62].mxu1  ;;  %v2558_v20 = vpop.f32.mrb[70].mxu0  ;;  %v4397_v14 = vld [vmem:[%s5293_s7 + $0x1e8] sm:$0xff]  }
 0x4ea   : > { %4274 = vrot.lane.b32.xlu0 %v4273_v3, %s4418_s22  ;;  %v4165_v17 = vpop.f32.mrb[63].mxu1  ;;  %v4183_v30 = vpop.f32.mrb[71].mxu0  ;;  %v4396_v3 = vld [vmem:[%s5293_s7 + $0x1a0] sm:$0xff]   ;;  %v4400_v16 = vld [vmem:[%s5293_s7 + $0x1b0] sm:$0xff]   ;;  %v4402_v20 = vld [vmem:[%s5293_s7 + $0x1b8] sm:$0xff]  }
 0x4eb   : > { %v4401_v17 = vld [vmem:[%s5293_s7 + $0x1f8] sm:$0xff]  }
 0x4ef   : > { %v2510_v21 = vpop.f32.mrb[64].mxu1 }
 0x4f0   : > { %v4176_v23 = vpop.f32.mrb[65].mxu1 }
 0x4f1   : > { %v2513_v24 = vpop.f32.mrb[66].mxu1 }
 0x4f2   : > { %v4177_v36 = vpop.f32.mrb[67].mxu1 }
 0x4f7   : > { %v2600_v25 = vpop.f32.mrb[68].mxu1 }
 0x4f8   : > { %v4278_v26 = vpack.i.bf16 %v2510_v21, %v2600_v25  ;;  %v4188_v28 = vpop.f32.mrb[69].mxu1 }
 0x4f9   : > { %v2603_v29 = vpop.f32.mrb[70].mxu1 }
 0x4fa   : > { %4279 = vrot.lane.b32.xlu1 %v4278_v26, %s4418_s22  ;;  %v4189_v31 = vpop.f32.mrb[71].mxu1 }
 0x53c   : > { %v4265_v33 = vpop.permute.xlu0 %4264 }
 0x53d   : > { %v4267_v34 = vunpack.i.h.bf16 %v4265_v33  ;;  %v4266_v35 = vunpack.i.l.bf16 %v4265_v33 }
 0x53f   : > { %v2638_v37 = vsel %vm453_vm0, %v5101_v63, %v4267_v34  ;;  %v2639_v38 = vsel %vm453_vm0, %v5103_v15, %v4266_v35  ;;  %v4370_v63 = vld [vmem:[%s5293_s7 + $0x108] sm:$0xff]   ;;  %v4372_v15 = vld [vmem:[%s5293_s7 + $0x150] sm:$0xff]   ;;  %v3566_v34 = vld [vmem:[%s5294_s8] ss:$0 sm:$0xff] }
 0x540   : > { %v2646_v39 = vpack.c.bf16 %v2638_v37, %v2638_v37  ;;  %v2647_v40 = vpack.c.bf16 %v2639_v38, %v2639_v38 }
 0x542   : > { %3205 = vmatprep.mubr.bf16.mxu0 %v2647_v40 }
 0x543   : > { %3206 = vmatmul.mubr.bf16.vlgmr.msra.gmra.mrb[72].mxu0 %v2646_v39 }
 0x544   : > { %3843 = vmatpush3.bf16.msra.mxu0 %v4366_v41 }
 0x545   : > { %3844 = vmatprep.subr.bf16.mxu0 %v4368_v42 }
 0x548   : > { %3845 = vmatpush3.bf16.msra.mxu0 %v4370_v63 }
 0x549   : > { %3846 = vmatprep.subr.bf16.mxu0 %v4372_v15 }
 0x54c   : > { %3847 = vmatpush3.bf16.msra.mxu0 %v4374_v43  ;;  %v4270_v44 = vpop.permute.xlu1 %4269 }
 0x54d   : > { %v4272_v46 = vunpack.i.h.bf16 %v4270_v44  ;;  %v4271_v47 = vunpack.i.l.bf16 %v4270_v44  ;;  %3848 = vmatprep.subr.bf16.mxu0 %v4376_v54 }
 0x54f   : > { %v2640_v49 = vsel %vm453_vm0, %v5129_v32, %v4272_v46  ;;  %v2641_v50 = vsel %vm453_vm0, %v5141_v58, %v4271_v47  ;;  %v4384_v32 = vld [vmem:[%s5293_s7 + $0x1c8] sm:$0xff]  }
 0x550   : > { %v2648_v51 = vpack.c.bf16 %v2640_v49, %v2640_v49  ;;  %v2649_v22 = vpack.c.bf16 %v2641_v50, %v2641_v50  ;;  %3849 = vmatpush3.bf16.msra.mxu0 %v4378_v45  ;;  %v4385_v58 = vld [vmem:[%s5293_s7 + $0x128] sm:$0xff]  }
 0x551   : > { %3850 = vmatprep.subr.bf16.mxu0 %v4379_v48 }
 0x552   : > { %3245 = vmatprep.mubr.bf16.mxu1 %v2649_v22 }
 0x553   : > { %3246 = vmatmul.mubr.bf16.vlgmr.msra.gmra.mrb[72].mxu1 %v2648_v51 }
 0x554   : > { %3851 = vmatpush3.bf16.msra.mxu0 %v4381_v52  ;;  %3865 = vmatpush3.bf16.msra.mxu1 %v4382_v27 }
 0x555   : > { %3852 = vmatprep.subr.bf16.mxu0 %v4383_v55  ;;  %3866 = vmatprep.subr.bf16.mxu1 %v4384_v32 }
 0x558   : > { %3853 = vmatpush3.bf16.msra.mxu0 %v4385_v58  ;;  %3867 = vmatpush3.bf16.msra.mxu1 %v4386_v56 }
 0x559   : > { %3854 = vmatprep.subr.bf16.mxu0 %v4387_v9  ;;  %3868 = vmatprep.subr.bf16.mxu1 %v4388_v57 }
 0x55c   : > { %3855 = vmatpush3.bf16.msra.mxu0 %v4389_v59  ;;  %3869 = vmatpush3.bf16.msra.mxu1 %v4390_v60  ;;  %v4275_v1 = vpop.permute.xlu0 %4274 }
 0x55d   : > { %v4277_v5 = vunpack.i.h.bf16 %v4275_v1  ;;  %v4276_v6 = vunpack.i.l.bf16 %v4275_v1  ;;  %3856 = vmatprep.subr.bf16.mxu0 %v4391_v61  ;;  %3870 = vmatprep.subr.bf16.mxu1 %v4392_v0 }
 0x55f   : > { %v2642_v10 = vsel %vm453_vm0, %v5152_v53, %v4277_v5  ;;  %v2643_v11 = vsel %vm453_vm0, %v5155_v62, %v4276_v6  ;;  %v4398_v53 = vld [vmem:[%s5293_s7 + $0x1a8] sm:$0xff]   ;;  %v4399_v62 = vld [vmem:[%s5293_s7 + $0x1f0] sm:$0xff]  }
 0x560   : > { %v2650_v12 = vpack.c.bf16 %v2642_v10, %v2642_v10  ;;  %v2651_v13 = vpack.c.bf16 %v2643_v11, %v2643_v11  ;;  %3857 = vmatpush3.bf16.msra.mxu0 %v4393_v2  ;;  %3871 = vmatpush3.bf16.msra.mxu1 %v4394_v4  ;;  %v3357_v11 = vld [vmem:[%s5295_s9] sm:$0xf] }
 0x561   : > { %3872 = vmatprep.subr.bf16.mxu1 %v4395_v7 }
 0x562   : > { %3285 = vmatprep.mubr.bf16.mxu0 %v2651_v13 }
 0x563   : > { %3286 = vmatmul.mubr.bf16.vlgmr.msra.gmra.mrb[76].mxu0 %v2650_v12 }
 0x564   : > { %3873 = vmatpush3.bf16.msra.mxu1 %v4396_v3 }
 0x565   : > { %3874 = vmatprep.subr.bf16.mxu1 %v4397_v14 }
 0x568   : > { %3875 = vmatpush3.bf16.msra.mxu1 %v4398_v53 }
 0x569   : > { %3876 = vmatprep.subr.bf16.mxu1 %v4399_v62 }
 0x56c   : > { %3877 = vmatpush3.bf16.msra.mxu1 %v4400_v16  ;;  %v4280_v19 = vpop.permute.xlu1 %4279 }
 0x56d   : > { %v4282_v21 = vunpack.i.h.bf16 %v4280_v19  ;;  %v4281_v30 = vunpack.i.l.bf16 %v4280_v19  ;;  %3878 = vmatprep.subr.bf16.mxu1 %v4401_v17 }
 0x56f   : > { %v2644_v23 = vsel %vm453_vm0, %v5157_v8, %v4282_v21  ;;  %v2645_v24 = vsel %vm453_vm0, %v5160_v18, %v4281_v30  ;;  %v3369_v21 = vld [vmem:[#allocation2] sm:$0x1] }
 0x570   : > { %v2652_v36 = vpack.c.bf16 %v2644_v23, %v2644_v23  ;;  %v2653_v25 = vpack.c.bf16 %v2645_v24, %v2645_v24  ;;  %3879 = vmatpush3.bf16.msra.mxu1 %v4402_v20 }
 0x572   : > { %3325 = vmatprep.mubr.bf16.mxu1 %v2653_v25 }
 0x573   : > { %3326 = vmatmul.mubr.bf16.vlgmr.msra.gmra.mrb[76].mxu1 %v2652_v36 }
 0x616   : > { %v3814_v26 = vpop.f32.mrb[72].mxu0 }
 0x617   : > { %v3815_v28 = vpop.f32.mrb[73].mxu0 }
 0x618   : > { %v3816_v29 = vadd.f32 %v3815_v28, %v3814_v26  ;;  %v3817_v31 = vpop.f32.mrb[74].mxu0 }
 0x619   : > { %v3818_v33 = vpop.f32.mrb[75].mxu0 }
 0x61a   : > { %v3208_v8 = vadd.f32 %v3816_v29, %v3566_v34 }
 0x626   : > { %v3836_v35 = vpop.f32.mrb[72].mxu1 }
 0x627   : > { %v3837_v37 = vpop.f32.mrb[73].mxu1 }
 0x628   : > { %v3838_v38 = vadd.f32 %v3837_v37, %v3836_v35  ;;  %v3839_v39 = vpop.f32.mrb[74].mxu1 }
 0x629   : > { %v3840_v18 = vpop.f32.mrb[75].mxu1 }
 0x62a   : > { %v3248_v40 = vadd.f32 %v3838_v38, %v3208_v8 }
 0x636   : > { %v3858_v41 = vpop.f32.mrb[76].mxu0 }
 0x637   : > { %v3859_v42 = vpop.f32.mrb[77].mxu0 }
 0x638   : > { %v3860_v63 = vadd.f32 %v3859_v42, %v3858_v41  ;;  %v3861_v15 = vpop.f32.mrb[78].mxu0 }
 0x639   : > { %v3862_v43 = vpop.f32.mrb[79].mxu0 }
 0x63a   : > { %v3288_v54 = vadd.f32 %v3860_v63, %v3248_v40 }
 0x646   : > { %v3880_v44 = vpop.f32.mrb[76].mxu1 }
 0x647   : > { %v3881_v45 = vpop.f32.mrb[77].mxu1 }
 0x648   : > { %v3882_v46 = vadd.f32 %v3881_v45, %v3880_v44  ;;  %v3883_v47 = vpop.f32.mrb[78].mxu1 }
 0x649   : > { %v3884_v48 = vpop.f32.mrb[79].mxu1 }
 0x64a   : > { %v3328_v49 = vadd.f32 %v3882_v46, %v3288_v54 }
 0x64c   : > { %v3334_v50 = vsel %vm3333_vm5, %v3328_v49, 0.0 }
 0x64d   : > { %v3335_v51 = vrot.slane %v3334_v50, 4 }
 0x64f   : > { %v3336_v22 = vadd.f32 %v3335_v51, %v3334_v50 }
 0x651   : > { %v3337_v52 = vrot.slane %v3336_v22, 2 }
 0x653   : > { %v3338_v27 = vadd.f32 %v3337_v52, %v3336_v22 }
 0x655   : > { %v3339_v55 = vrot.slane %v3338_v27, 1 }
 0x657   : > { %v3340_v32 = vadd.f32 %v3339_v55, %v3338_v27 }
 0x659   : > { %v3341_v58 = vmul.f32 0.25, %v3340_v32 }
 0x65b   : > { %v3342_v56 = vsub.f32 %v3328_v49, %v3341_v58 }
 0x65d   : > { %v3343_v9 = vmul.f32 %v3342_v56, %v3342_v56 }
 0x65f   : > { %v3344_v57 = vsel %vm3333_vm5, %v3343_v9, 0.0 }
 0x660   : > { %v3345_v59 = vrot.slane %v3344_v57, 4 }
 0x662   : > { %v3346_v60 = vadd.f32 %v3345_v59, %v3344_v57 }
 0x664   : > { %v3347_v61 = vrot.slane %v3346_v60, 2 }
 0x666   : > { %v3348_v0 = vadd.f32 %v3347_v61, %v3346_v60 }
 0x668   : > { %v3349_v1 = vrot.slane %v3348_v0, 1 }
 0x66a   : > { %v3350_v2 = vadd.f32 %v3349_v1, %v3348_v0 }
 0x66c   : > { %v3351_v4 = vmul.f32 0.25, %v3350_v2 }
 0x66e   : > { %v3352_v5 = vadd.f32 1e-05, %v3351_v4 }
 0x670   : > { %4405 = vrsqrt.f32 %v3352_v5 }
 0x67a   : > { %v4406_v6 = vpop.eup %4405 }
 0x67b   : > { %v3354_v7 = vmul.f32 %v4406_v6, %v3342_v56 }
 0x67d   : > { %v3355_v10 = vmul.f32 0.2, %v3354_v7 }
 0x67f   : > { %v3356_v12 = vmax.f32 %v3354_v7, %v3355_v10 }
 0x681   : > { %v3358_v13 = vmul.f32 %v3357_v11, %v3356_v12 }
 0x683   : > { %v3359_v3 = vsel %vm3333_vm5, %v3358_v13, 0.0 }
 0x684   : > { %3360 = vadd.xlane.f32.xlu0 %v3359_v3 }
 0x711   : > { %v3361_v14 = vpop.xlane.xlu0 %3360 }
 0x712   : > { %v3362_v53 = vsel %vm3333_vm5, %v3361_v14, 0.0 }
 0x713   : > { %v3363_v62 = vrot.slane %v3362_v53, 4 }
 0x715   : > { %v3364_v16 = vadd.f32 %v3363_v62, %v3362_v53 }
 0x717   : > { %v3365_v17 = vrot.slane %v3364_v16, 2 }
 0x719   : > { %v3366_v19 = vadd.f32 %v3365_v17, %v3364_v16 }
 0x71b   : > { %v3367_v20 = vrot.slane %v3366_v19, 1 }
 0x71d   : > { %v3368_v30 = vadd.f32 %v3367_v20, %v3366_v19 }
 0x71f   : > { %v3370_v23 = vadd.f32 %v3369_v21, %v3368_v30 }
 0x721   : > { %3372 = vst.msk [vmem:[%s384_s28] sm:$0x1] %vm3371_vm6, %v3370_v23 }
 0x722 PF: > { %s23_s19 = sadd.s32 1, %s4413_s19  }
 0x723   : > { %p20_p4 = scmp.ge.s32.totalorder %s23_s19, 4  }
 0x725   :  { %22 = sbr.rel (!%p20_p4) target bundleno = 3 (0x3), region = 124 }

</bundles_post_ra>
